<compile_context>
chip_gen: v7x
topology: tpu7x:2x2x1
jax: 0.10.0
libtpu: 0.0.40
codegen_flags: <defaults>
</compile_context>

<pallas_src>
import functools

import jax
import jax.numpy as jnp
from jax.experimental import pallas as pl
from jax.experimental.pallas import tpu as pltpu


def _round_up(x: int, m: int) -> int:
    return (x + m - 1) // m * m


# ----------------------------------------------------------------------------
# Glue: graph-structure setup (not the hot path).
# TODO(synk): magnetic_edge_laplacian / degree_normalization are external
# helpers in the original repo; reconstructed here from their standard
# definitions (magnetic incidence matrix B, L = B^H B, symmetric degree
# normalization).
# ----------------------------------------------------------------------------
def magnetic_edge_laplacian(edge_index, undirected_mask, matrix_type, q, num_nodes):
    src = edge_index[0]
    dst = edge_index[1]
    num_edges = src.shape[0]
    theta = jnp.where(undirected_mask, 0.0, 2.0 * jnp.pi * q).astype(jnp.float32)
    phase = jnp.exp(1j * theta).astype(jnp.complex64)
    sign_src = -1.0 if matrix_type == "orientation-equivariant" else 1.0
    e_ids = jnp.arange(num_edges)
    B = jnp.zeros((num_nodes, num_edges), dtype=jnp.complex64)
    B = B.at[src, e_ids].add(sign_src * jnp.conj(phase))
    B = B.at[dst, e_ids].add(phase)
    return jnp.conj(B).T @ B


def degree_normalization(L):
    deg = jnp.abs(jnp.diagonal(L)).real
    d_inv_sqrt = jnp.where(deg > 0.0, 1.0 / jnp.sqrt(deg), 0.0).astype(jnp.float32)
    return (d_inv_sqrt[:, None] * L) * d_inv_sqrt[None, :]


# ----------------------------------------------------------------------------
# Pallas kernel: fused projection + complex L @ Z + skip + bias.
# Grid: (i over L row tiles [parallel], k over L column tiles [arbitrary]).
# ----------------------------------------------------------------------------
def _magnetic_edge_conv_kernel(
    lre_ref, lim_ref, xm_ref, xk_ref, wzz_ref, wsk_ref, b_ref, o_ref, acc_ref
):
    k = pl.program_id(1)

    @pl.when(k == 0)
    def _():
        acc_ref[...] = jnp.zeros_like(acc_ref)

    lre = lre_ref[...]
    lim = lim_ref[...]
    # Fused projection for this k-tile of edges: X_k @ [W|W_swap] -> (tk, 4*Fp)
    zz = jnp.dot(xk_ref[...], wzz_ref[...], preferred_element_type=jnp.float32)
    zz = zz.astype(lre.dtype)                 # bf16 on v6e/v7x path, f32 otherwise
    two_fp = zz.shape[-1] // 2                # slice at a 128-lane boundary
    # Complex matmul as 2 lane-dense real MXU matmuls with f32 accumulation:
    #   acc += L_re @ [Zre|Zim] + L_im @ [-Zim|Zre]  == [Yre | Yim]
    acc_ref[...] += (
        jnp.dot(lre, zz[:, :two_fp], preferred_element_type=jnp.float32)
        + jnp.dot(lim, zz[:, two_fp:], preferred_element_type=jnp.float32)
    )

    @pl.when(k == pl.num_programs(1) - 1)
    def _():
        # Finalize-only skip projection + bias (kept out of the k loop).
        skip = jnp.dot(xm_ref[...], wsk_ref[...], preferred_element_type=jnp.float32)
        o_ref[...] = (acc_ref[...] + skip + b_ref[...]).astype(o_ref.dtype)


def magnetic_edge_conv_pallas(
    edge_index, edge_attr, undirected_mask,
    w_all, w_skip, bias,
    *, matrix_type, q, num_nodes, gcn_normalize=False,
    l_dtype=jnp.float32,
):
    E, c_in = edge_attr.shape
    c_out = w_all.shape[0]
    F = c_out // 2

    # ---- graph-structure setup (plain JAX glue) ----
    L = magnetic_edge_laplacian(edge_index, undirected_mask, matrix_type, q, num_nodes)
    L = L.astype(jnp.complex64)
    L = degree_normalization(L)
    if gcn_normalize:
        L = -L / 2 + jnp.eye(L.shape[0], dtype=L.dtype)
    L_re = jnp.real(L).astype(jnp.float32)
    L_im = jnp.imag(L).astype(jnp.float32)

    # ---- padding / tiling ----
    Fp = _round_up(F, 64)                 # 2*Fp multiple of 128 -> lane-dense out
    c_in_pad = _round_up(c_in, 128)
    tm = 256                              # L row tile ("parallel")
    E_pad = _round_up(E, tm)
    tk = tm                               # contraction tile ("arbitrary")
    for cand in (2048, 1024, 512):
        if E_pad % cand == 0:
            tk = cand
            break

    def pad2(a, rows, cols):
        return jnp.pad(a, ((0, rows - a.shape[0]), (0, cols - a.shape[1])))

    # PyTorch Linear weight is [out, in]; y = x @ W.T. De-interleave even=re, odd=im.
    w_all_t = w_all.T.astype(jnp.float32)
    w_skip_t = w_skip.T.astype(jnp.float32)
    war = pad2(w_all_t[:, 0::2], c_in_pad, Fp)
    wai = pad2(w_all_t[:, 1::2], c_in_pad, Fp)
    wsr = pad2(w_skip_t[:, 0::2], c_in_pad, Fp)
    wsi = pad2(w_skip_t[:, 1::2], c_in_pad, Fp)
    w_zz = jnp.concatenate([war, wai, -wai, war], axis=1)   # [c_in_pad, 4*Fp]
    w_sk = jnp.concatenate([wsr, wsi], axis=1)               # [c_in_pad, 2*Fp]
    b2 = jnp.concatenate([
        jnp.pad(bias[0::2].astype(jnp.float32), (0, Fp - F)),
        jnp.pad(bias[1::2].astype(jnp.float32), (0, Fp - F)),
    ]).reshape(1, 2 * Fp)
    # TODO(synk): bias=False / skip_connection=False module variants would just
    # drop the corresponding finalize terms; not wired up here.

    x_pad = pad2(edge_attr.astype(jnp.float32), E_pad, c_in_pad)
    L_re_p = pad2(L_re, E_pad, E_pad).astype(l_dtype)
    L_im_p = pad2(L_im, E_pad, E_pad).astype(l_dtype)

    num_m = E_pad // tm
    num_k = E_pad // tk

    cost = pl.CostEstimate(
        flops=int(
            2 * 2 * E_pad * E_pad * (2 * Fp)                # L_re@Z + L_im@Zswap
            + num_m * 2 * E_pad * c_in_pad * (4 * Fp)       # fused projection
            + 2 * E_pad * c_in_pad * (2 * Fp)               # skip projection
        ),
        transcendentals=0,
        bytes_accessed=int(
            2 * E_pad * E_pad * jnp.dtype(l_dtype).itemsize
            + (num_m + 1) * E_pad * c_in_pad * 4
            + E_pad * 2 * Fp * 4
        ),
    )

    out = pl.pallas_call(
        _magnetic_edge_conv_kernel,
        out_shape=jax.ShapeDtypeStruct((E_pad, 2 * Fp), jnp.float32),
        grid_spec=pltpu.PrefetchScalarGridSpec(
            num_scalar_prefetch=0,
            grid=(num_m, num_k),
            in_specs=[
                pl.BlockSpec((tm, tk), lambda i, k: (i, k)),            # L_re tile
                pl.BlockSpec((tm, tk), lambda i, k: (i, k)),            # L_im tile
                pl.BlockSpec((tm, c_in_pad), lambda i, k: (i, 0)),      # X rows (skip)
                pl.BlockSpec((tk, c_in_pad), lambda i, k: (k, 0)),      # X rows (Z_k)
                pl.BlockSpec((c_in_pad, 4 * Fp), lambda i, k: (0, 0)),  # fused W (resident)
                pl.BlockSpec((c_in_pad, 2 * Fp), lambda i, k: (0, 0)),  # skip W (resident)
                pl.BlockSpec((1, 2 * Fp), lambda i, k: (0, 0)),         # bias (resident)
            ],
            out_specs=pl.BlockSpec((tm, 2 * Fp), lambda i, k: (i, 0)),
            scratch_shapes=[pltpu.VMEM((tm, 2 * Fp), jnp.float32)],
        ),
        compiler_params=pltpu.CompilerParams(
            dimension_semantics=("parallel", "arbitrary"),
            vmem_limit_bytes=32 * 1024 * 1024,   # v7x-safe (64 MiB physical VMEM)
        ),
        cost_estimate=cost,
    )(L_re_p, L_im_p, x_pad, x_pad, w_zz, w_sk, b2)

    # Glue: un-pad and interleave (real, imag) back into [E, C_out]
    # == torch.view_as_real(...).reshape(-1, C_out).
    out_re = out[:E, :F]
    out_im = out[:E, Fp:Fp + F]
    return jnp.stack([out_re, out_im], axis=-1).reshape(E, c_out)


# ----------------------------------------------------------------------------
# Pure-JAX reference (mirrors the PyTorch forward exactly).
# ----------------------------------------------------------------------------
def magnetic_edge_conv_ref(
    edge_index, edge_attr, undirected_mask,
    w_all, w_skip, bias,
    *, matrix_type, q, num_nodes, gcn_normalize=False,
):
    c_out = w_all.shape[0]
    edge_attr_all = (edge_attr @ w_all.T).reshape(-1, c_out // 2, 2)
    edge_attr_skip = edge_attr @ w_skip.T
    L = magnetic_edge_laplacian(edge_index, undirected_mask, matrix_type, q, num_nodes)
    L = L.astype(jnp.complex64)
    L = degree_normalization(L)
    if gcn_normalize:
        L = -L / 2 + jnp.eye(L.shape[0], dtype=L.dtype)
    z = edge_attr_all[..., 0] + 1j * edge_attr_all[..., 1]   # view_as_complex
    y = L @ z
    out = jnp.stack([jnp.real(y), jnp.imag(y)], axis=-1).reshape(-1, c_out)
    out = out + edge_attr_skip
    out = out + bias
    return out


if __name__ == "__main__":
    key = jax.random.PRNGKey(0)
    k_src, k_dst, k_mask, k_attr, k_wall, k_wskip, k_bias = jax.random.split(key, 7)

    num_nodes = 64
    num_edges = 600          # pads to E_pad=768 -> 3x3 grid (exercises accumulation)
    in_channels = 32
    out_channels = 64
    matrix_type = "orientation-equivariant"
    q = 0.25

    src = jax.random.randint(k_src, (num_edges,), 0, num_nodes, dtype=jnp.int32)
    dst = jax.random.randint(k_dst, (num_edges,), 0, num_nodes, dtype=jnp.int32)
    edge_index = jnp.stack([src, dst], axis=0)                      # [2, E]
    undirected_mask = jax.random.bernoulli(k_mask, 0.5, (num_edges,))
    edge_attr = jax.random.normal(k_attr, (num_edges, in_channels), dtype=jnp.float32)

    # PyTorch Linear init: uniform(-1/sqrt(in), 1/sqrt(in)); reset_parameters: bias=0.
    bound = 1.0 / jnp.sqrt(jnp.float32(in_channels))
    w_all = jax.random.uniform(k_wall, (out_channels, in_channels),
                               minval=-bound, maxval=bound, dtype=jnp.float32)
    w_skip = jax.random.uniform(k_wskip, (out_channels, in_channels),
                                minval=-bound, maxval=bound, dtype=jnp.float32)
    bias = jnp.zeros((out_channels,), dtype=jnp.float32)

    ref = magnetic_edge_conv_ref(
        edge_index, edge_attr, undirected_mask, w_all, w_skip, bias,
        matrix_type=matrix_type, q=q, num_nodes=num_nodes, gcn_normalize=False,
    )

    run = functools.partial(
        magnetic_edge_conv_pallas,
        matrix_type=matrix_type, q=q, num_nodes=num_nodes, gcn_normalize=False,
    )

    # f32 path (v5e default; strict tolerance).
    out_f32 = run(edge_index, edge_attr, undirected_mask, w_all, w_skip, bias,
                  l_dtype=jnp.float32)
    out_f32 = jax.block_until_ready(out_f32)
    assert out_f32.shape == (num_edges, out_channels)
    assert jnp.allclose(out_f32, ref, atol=1e-3, rtol=1e-3), \
        f"f32 max abs diff = {jnp.max(jnp.abs(out_f32 - ref))}"

    # bf16-L path (v6e/v7x recommendation; looser tolerance, f32 accumulation).
    out_bf16 = run(edge_index, edge_attr, undirected_mask, w_all, w_skip, bias,
                   l_dtype=jnp.bfloat16)
    out_bf16 = jax.block_until_ready(out_bf16)
    assert jnp.allclose(out_bf16, ref, atol=0.3, rtol=0.05), \
        f"bf16 max abs diff = {jnp.max(jnp.abs(out_bf16 - ref))}"

    print("KERNEL_OK")
</pallas_src>

<mosaic_0001>
module attributes {stable_mosaic.version = 11 : i64} {
  func.func @_magnetic_edge_conv_kernel(%arg0: i32, %arg1: i32, %arg2: memref<256x256xf32, #tpu.memory_space<vmem>>, %arg3: memref<256x256xf32, #tpu.memory_space<vmem>>, %arg4: memref<256x128xf32, #tpu.memory_space<vmem>>, %arg5: memref<256x128xf32, #tpu.memory_space<vmem>>, %arg6: memref<128x256xf32, #tpu.memory_space<vmem>>, %arg7: memref<128x128xf32, #tpu.memory_space<vmem>>, %arg8: memref<1x128xf32, #tpu.memory_space<vmem>>, %arg9: memref<256x128xf32, #tpu.memory_space<vmem>>, %arg10: memref<256x128xf32, #tpu.memory_space<vmem>>) attributes {dimension_semantics = [#tpu.dimension_semantics<parallel>, #tpu.dimension_semantics<arbitrary>], iteration_bounds = array<i64: 3, 3>, scalar_prefetch = 0 : i64, scratch_operands = 1 : i64, tpu.core_type = #tpu.core_type<tc>, window_params = [{transform_indices = @transform_0, window_bounds = array<i64: 256, 256>}, {transform_indices = @transform_1, window_bounds = array<i64: 256, 256>}, {transform_indices = @transform_2, window_bounds = array<i64: 256, 128>}, {transform_indices = @transform_3, window_bounds = array<i64: 256, 128>}, {pipeline_mode = #tpu.pipeline_mode<synchronous>, transform_indices = @transform_4, window_bounds = array<i64: 128, 256>}, {pipeline_mode = #tpu.pipeline_mode<synchronous>, transform_indices = @transform_5, window_bounds = array<i64: 128, 128>}, {pipeline_mode = #tpu.pipeline_mode<synchronous>, transform_indices = @transform_6, window_bounds = array<i64: 1, 128>}, {transform_indices = @transform_7, window_bounds = array<i64: 256, 128>}]} {
    %c0_i32 = arith.constant 0 : i32
    %0 = arith.cmpi eq, %arg1, %c0_i32 : i32
    %1 = arith.extui %0 : i1 to i32
    %c0_i32_0 = arith.constant 0 : i32
    %2 = arith.cmpi ne, %1, %c0_i32_0 : i32
    scf.if %2 {
      %cst_15 = arith.constant 0.000000e+00 : f32
      %19 = vector.broadcast %cst_15 : f32 to vector<256x128xf32>
      %c0_16 = arith.constant 0 : index
      %c0_17 = arith.constant 0 : index
      %20 = vector.load %arg10[%c0_16, %c0_17] : memref<256x128xf32, #tpu.memory_space<vmem>>, vector<256x128xf32>
      tpu.vector_store %arg10[%c0_16, %c0_17], %19 {strides = array<i32>} : memref<256x128xf32, #tpu.memory_space<vmem>>, vector<256x128xf32>,
    } else {
    }
    %c0 = arith.constant 0 : index
    %c0_1 = arith.constant 0 : index
    %3 = vector.load %arg2[%c0, %c0_1] : memref<256x256xf32, #tpu.memory_space<vmem>>, vector<256x256xf32>
    %c0_2 = arith.constant 0 : index
    %c0_3 = arith.constant 0 : index
    %4 = vector.load %arg3[%c0_2, %c0_3] : memref<256x256xf32, #tpu.memory_space<vmem>>, vector<256x256xf32>
    %c0_4 = arith.constant 0 : index
    %c0_5 = arith.constant 0 : index
    %5 = vector.load %arg5[%c0_4, %c0_5] : memref<256x128xf32, #tpu.memory_space<vmem>>, vector<256x128xf32>
    %c0_6 = arith.constant 0 : index
    %c0_7 = arith.constant 0 : index
    %6 = vector.load %arg6[%c0_6, %c0_7] : memref<128x256xf32, #tpu.memory_space<vmem>>, vector<128x256xf32>
    %cst = arith.constant dense<0.000000e+00> : vector<256x256xf32>
    %7 = tpu.matmul %5, %6, %cst {dimension_numbers = #tpu.dot_dimension_numbers<[1], [0], [0], [1], [0, 0, 1, 1], [], []>} : vector<256x128xf32>, vector<128x256xf32>, vector<256x256xf32> -> vector<256x256xf32>
    %c0_8 = arith.constant 0 : index
    %c0_9 = arith.constant 0 : index
    %8 = vector.load %arg10[%c0_8, %c0_9] : memref<256x128xf32, #tpu.memory_space<vmem>>, vector<256x128xf32>
    %9 = vector.extract_strided_slice %7 {offsets = [0, 0], sizes = [256, 128], strides = [1, 1]} : vector<256x256xf32> to vector<256x128xf32>
    %cst_10 = arith.constant dense<0.000000e+00> : vector<256x128xf32>
    %10 = tpu.matmul %3, %9, %cst_10 {dimension_numbers = #tpu.dot_dimension_numbers<[1], [0], [0], [1], [0, 0, 1, 1], [], []>} : vector<256x256xf32>, vector<256x128xf32>, vector<256x128xf32> -> vector<256x128xf32>
    %11 = vector.extract_strided_slice %7 {offsets = [0, 128], sizes = [256, 128], strides = [1, 1]} : vector<256x256xf32> to vector<256x128xf32>
    %cst_11 = arith.constant dense<0.000000e+00> : vector<256x128xf32>
    %12 = tpu.matmul %4, %11, %cst_11 {dimension_numbers = #tpu.dot_dimension_numbers<[1], [0], [0], [1], [0, 0, 1, 1], [], []>} : vector<256x256xf32>, vector<256x128xf32>, vector<256x128xf32> -> vector<256x128xf32>
    %13 = arith.addf %10, %12 : vector<256x128xf32>
    %14 = arith.addf %8, %13 : vector<256x128xf32>
    %c0_12 = arith.constant 0 : index
    %c0_13 = arith.constant 0 : index
    %15 = vector.load %arg10[%c0_12, %c0_13] : memref<256x128xf32, #tpu.memory_space<vmem>>, vector<256x128xf32>
    tpu.vector_store %arg10[%c0_12, %c0_13], %14 {strides = array<i32>} : memref<256x128xf32, #tpu.memory_space<vmem>>, vector<256x128xf32>,
    %c2_i32 = arith.constant 2 : i32
    %16 = arith.cmpi eq, %arg1, %c2_i32 : i32
    %17 = arith.extui %16 : i1 to i32
    %c0_i32_14 = arith.constant 0 : i32
    %18 = arith.cmpi ne, %17, %c0_i32_14 : i32
    scf.if %18 {
      %c0_15 = arith.constant 0 : index
      %c0_16 = arith.constant 0 : index
      %19 = vector.load %arg4[%c0_15, %c0_16] : memref<256x128xf32, #tpu.memory_space<vmem>>, vector<256x128xf32>
      %c0_17 = arith.constant 0 : index
      %c0_18 = arith.constant 0 : index
      %20 = vector.load %arg7[%c0_17, %c0_18] : memref<128x128xf32, #tpu.memory_space<vmem>>, vector<128x128xf32>
      %cst_19 = arith.constant dense<0.000000e+00> : vector<256x128xf32>
      %21 = tpu.matmul %19, %20, %cst_19 {dimension_numbers = #tpu.dot_dimension_numbers<[1], [0], [0], [1], [0, 0, 1, 1], [], []>} : vector<256x128xf32>, vector<128x128xf32>, vector<256x128xf32> -> vector<256x128xf32>
      %c0_20 = arith.constant 0 : index
      %c0_21 = arith.constant 0 : index
      %22 = vector.load %arg10[%c0_20, %c0_21] : memref<256x128xf32, #tpu.memory_space<vmem>>, vector<256x128xf32>
      %23 = arith.addf %22, %21 : vector<256x128xf32>
      %c0_22 = arith.constant 0 : index
      %c0_23 = arith.constant 0 : index
      %24 = vector.load %arg8[%c0_22, %c0_23] : memref<1x128xf32, #tpu.memory_space<vmem>>, vector<1x128xf32>
      %25 = vector.broadcast %24 : vector<1x128xf32> to vector<256x128xf32>
      %26 = arith.addf %23, %25 : vector<256x128xf32>
      %c0_24 = arith.constant 0 : index
      %c0_25 = arith.constant 0 : index
      %27 = vector.load %arg9[%c0_24, %c0_25] : memref<256x128xf32, #tpu.memory_space<vmem>>, vector<256x128xf32>
      tpu.vector_store %arg9[%c0_24, %c0_25], %26 {strides = array<i32>} : memref<256x128xf32, #tpu.memory_space<vmem>>, vector<256x128xf32>,
    } else {
    }
    return
  }
  func.func @transform_0(%arg0: i32, %arg1: i32) -> (i32, i32) {
    %c0_i32 = arith.constant 0 : i32
    return %arg0, %arg1 : i32, i32
  }
  func.func @transform_1(%arg0: i32, %arg1: i32) -> (i32, i32) {
    %c0_i32 = arith.constant 0 : i32
    return %arg0, %arg1 : i32, i32
  }
  func.func @transform_2(%arg0: i32, %arg1: i32) -> (i32, i32) {
    %c0_i32 = arith.constant 0 : i32
    %c0_i32_0 = arith.constant 0 : i32
    return %arg0, %c0_i32 : i32, i32
  }
  func.func @transform_3(%arg0: i32, %arg1: i32) -> (i32, i32) {
    %c0_i32 = arith.constant 0 : i32
    %c0_i32_0 = arith.constant 0 : i32
    return %arg1, %c0_i32 : i32, i32
  }
  func.func @transform_4(%arg0: i32, %arg1: i32) -> (i32, i32) {
    %c0_i32 = arith.constant 0 : i32
    %c0_i32_0 = arith.constant 0 : i32
    %c0_i32_1 = arith.constant 0 : i32
    return %c0_i32, %c0_i32_0 : i32, i32
  }
  func.func @transform_5(%arg0: i32, %arg1: i32) -> (i32, i32) {
    %c0_i32 = arith.constant 0 : i32
    %c0_i32_0 = arith.constant 0 : i32
    %c0_i32_1 = arith.constant 0 : i32
    return %c0_i32, %c0_i32_0 : i32, i32
  }
  func.func @transform_6(%arg0: i32, %arg1: i32) -> (i32, i32) {
    %c0_i32 = arith.constant 0 : i32
    %c0_i32_0 = arith.constant 0 : i32
    %c0_i32_1 = arith.constant 0 : i32
    return %c0_i32, %c0_i32_0 : i32, i32
  }
  func.func @transform_7(%arg0: i32, %arg1: i32) -> (i32, i32) {
    %c0_i32 = arith.constant 0 : i32
    %c0_i32_0 = arith.constant 0 : i32
    return %arg0, %c0_i32 : i32, i32
  }
}

</mosaic_0001>

<bundles_post_ra>
// kernel: tpu_custom_call.1
= control target key start
LH: loop header
LB: loop body
LE: loop exit
PB: predicated region body
PF: predicated region fallthrough
CT: control target
= control target key end

     0   :  { %s4105_s0 = inlined_call_operand.hbm [shape: f32[768,768], index: 0, kind: input, shape index: {}]   ;;  %s4106_s1 = inlined_call_operand.hbm [shape: f32[768,768], index: 1, kind: input, shape index: {}]   ;;  %s4107_s2 = inlined_call_operand.hbm [shape: f32[768,128], index: 2, kind: input, shape index: {}]   ;;  %s4108_s3 = inlined_call_operand.hbm [shape: f32[768,128], index: 3, kind: input, shape index: {}]   ;;  %s4109_s4 = inlined_call_operand.hbm [shape: f32[128,256], index: 4, kind: input, shape index: {}]   ;;  %s4110_s5 = inlined_call_operand.hbm [shape: f32[128,128], index: 5, kind: input, shape index: {}]   ;;  %s4111_s6 = inlined_call_operand.hbm [shape: f32[1,128], index: 6, kind: input, shape index: {}]   ;;  %s4112_s7 = inlined_call_operand.hbm [shape: f32[768,128], index: 7, kind: output, shape index: {}]  }
   0x1   :  { %4145 = sst [smem:[#allocation36_spill]] %s4105_s0 }
   0x2   :  { %4146 = sst [smem:[#allocation37_spill]] %s4106_s1 }
   0x3   :  { %4147 = sst [smem:[#allocation38_spill]] %s4107_s2 }
   0x4   :  { %4148 = sst [smem:[#allocation39_spill]] %s4108_s3 }
   0x5   :  { %4149 = sst [smem:[#allocation40_spill]] %s4109_s4 }
   0x6   :  { %4150 = sst [smem:[#allocation41_spill]] %s4110_s5 }
   0x7   :  { %4151 = sst [smem:[#allocation42_spill]] %s4112_s7 }
   0x8   :  { %12 = vsyncpa [#allocation4], 0 }
   0x9   :  { %14 = vsyncpa [#allocation4 + $0x1], 0 }
   0xa   :  { %15 = vsyncpa [#allocation7], 0 }
   0xb   :  { %17 = vsyncpa [#allocation7 + $0x1], 0 }
   0xc   :  { %18 = vsyncpa [#allocation10], 0 }
   0xd   :  { %20 = vsyncpa [#allocation10 + $0x1], 0 }
   0xe   :  { %21 = vsyncpa [#allocation13], 0 }
   0xf   :  { %22 = vsyncpa [#allocation5], 0 }
  0x10   :  { %24 = vsyncpa [#allocation5 + $0x1], 0  ;;  %s3102_s24 = smov 0   ;;  %s3104_s25 = smov 0  }
  0x11   :  { %s3106_s26 = smov 0   ;;  %s3108_s27 = smov 0  }
  0x12   :  { %s3110_s28 = smov 0   ;;  %s3112_s29 = smov 0  }
  0x13   :  { %s3114_s30 = smov 0   ;;  %s3116_s8 = smov 0  }
  0x14   :  { %s3118_s9 = smov 0   ;;  %s3120_s10 = smov 0  }
  0x15   :  { %s3122_s11 = smov 0   ;;  %s3124_s12 = smov 0  }
  0x16   :  { %s3126_s13 = smov 0   ;;  %s3128_s14 = smov 0  }
  0x17 LB: > { %4152 = sst [smem:[#allocation23_spill]] %s2990_s24  ;;  %s3173_s15 = sadd.s32 4294967295, %s3042_s14   ;;  %s3042_s14 = sphi %s3128_s14, %s30_s14   ;;  %s3038_s13 = sphi %s3126_s13, %s4246_s13   ;;  %s3034_s12 = sphi %s3124_s12, %s4234_s12   ;;  %s3030_s11 = sphi %s3122_s11, %s4245_s11   ;;  %s3026_s10 = sphi %s3120_s10, %s4233_s10   ;;  %s3022_s9 = sphi %s3118_s9, %s4244_s9   ;;  %s3018_s8 = sphi %s3116_s8, %s4243_s8   ;;  %s3014_s30 = sphi %s3114_s30, %s4231_s30   ;;  %s3010_s29 = sphi %s3112_s29, %s4242_s29   ;;  %s3006_s28 = sphi %s3110_s28, %s4241_s28   ;;  %s3002_s27 = sphi %s3108_s27, %s4240_s27   ;;  %s2998_s26 = sphi %s3106_s26, %s4239_s26   ;;  %s2994_s25 = sphi %s3104_s25, %s4238_s25   ;;  %s2990_s24 = sphi %s3102_s24, %s4237_s24  }
  0x18   : > { %4153 = sst [smem:[#allocation24_spill]] %s2994_s25  ;;  %p2127_p0 = scmp.ge.s32.totalorder %s3042_s14, 1 }
  0x19   : > { %4154 = sst [smem:[#allocation25_spill]] %s2998_s26  ;;  %p4115_p1 = scmp.eq.s32.totalorder %s3173_s15, 0 }
  0x1a   : > { %4155 = sst [smem:[#allocation26_spill]] %s3018_s8  ;;  %p244_p3 = scmp.lt.s32.totalorder %s3042_s14, 10 }
  0x1b   : > { %4156 = sst [smem:[#allocation27_spill]] %s3026_s10  ;;  %s3044_s17 = smov [#allocation11]  }
  0x1c   : > { %4157 = sst [smem:[#allocation28_spill]] %s3030_s11  ;;  %p3179_p4 = pnand %p2127_p0, %p244_p3 }
  0x1d   : > { %4158 = sst [smem:[#allocation29_spill]] %s3034_s12  ;;  %s256_s18 = sshll.u32 %s3044_s17, 4  ;;  %s257_s18 = int_to_ptr.vmem [resolvable:$true] %s256_s18 }
  0x1e   : > { %s4159_s16 = scalar_select %p3179_p4, 1, 0 }
  0x1f   : > { %p2512_p5 = pneg %p3179_p4  ;;  %s3045_s20 = smov [#allocation12]  }
  0x20   : > { %4160 = sst [smem:[#allocation30_spill]] %s4159_s16  ;;  %s269_s21 = sshll.u32 %s3045_s20, 4  ;;  %s3191_s21 = int_to_ptr.vmem [resolvable:$true] %s269_s21 }
  0x21   : > { %p3187_p6 = pnand %p2512_p5, %p4115_p1  ;;  %s4162_s4 = sld [smem:[#allocation40_spill]] }
  0x23   : > { %s4161_s19 = scalar_select %p3187_p6, 1, 0 }
  0x24   : > { %p3201_p8 = pneg %p3187_p6 }
  0x27   : > { %s2672_s7 = scalar_lea.hbm %s4162_s4, 4096 }
  0x28   : > { %p2673_p7 = scmp.ne.s32.totalorder %s4162_s4, %s2672_s7  ;;  %p2679_p11 = scmp.lt.u32.totalorder %s2672_s7, %s4162_s4 }
  0x2a   : > { %p2675_p9 = pnand %p3201_p8, %p2673_p7 }
  0x2c   : > { %p2676_p10 = pneg %p2675_p9 }
  0x2e   : > { %p2681_p12 = pnand %p2679_p11, %p2676_p10 }
  0x30   : > { %2684 = shalt.err (!%p2681_p12)
}
  0x31   : > { %s2685_s22 = scalar_lea.vmem %s257_s18, 4096  ;;  %p2693_p5 = scmp.lt.s32.totalorder %s257_s18, %s257_s18 }
  0x32   : > { %p2686_p13 = scmp.ne.s32.totalorder %s257_s18, %s2685_s22  ;;  %p2694_p2 = scmp.lt.s32.totalorder %s2685_s22, %s2685_s22 }
  0x34   : > { %p2688_p0 = pnand %p2686_p13, %p3201_p8  ;;  %p2695_p1 = por %p2694_p2, %p2693_p5 }
  0x36   : > { %p2689_p3 = pneg %p2688_p0 }
  0x38   : > { %p2696_p4 = pnand %p2695_p1, %p2689_p3 }
  0x3a   : > { %2699 = shalt.err (!%p2696_p4)
}
  0x3b   : > { %s4124_s10 = smov 256   ;;  %s4126_s11 = smov 16  }
  0x3c   : > { %2515 = dma.hbm_to_vmem [thread:$0]  (!%p3187_p6), %s4162_s4, 4096, %s257_s18, [#allocation10], %s4124_s10, %s4124_s10, %s4126_s11  }
  0x3d   : > { %s4164_s5 = sld [smem:[#allocation41_spill]] }
  0x43   : > { %s2700_s3 = scalar_lea.hbm %s4164_s5, 2048 }
  0x44   : > { %p2701_p1 = scmp.ne.s32.totalorder %s4164_s5, %s2700_s3  ;;  %p2707_p7 = scmp.lt.u32.totalorder %s2700_s3, %s4164_s5 }
  0x46   : > { %p2703_p2 = pnand %p2701_p1, %p3201_p8 }
  0x48   : > { %p2704_p4 = pneg %p2703_p2 }
  0x4a   : > { %p2709_p9 = pnand %p2707_p7, %p2704_p4 }
  0x4c   : > { %2712 = shalt.err (!%p2709_p9)
}
  0x4d   : > { %s2713_s18 = scalar_lea.vmem %s3191_s21, 2048  ;;  %p2721_p13 = scmp.lt.s32.totalorder %s3191_s21, %s3191_s21 }
  0x4e   : > { %p2714_p10 = scmp.ne.s32.totalorder %s3191_s21, %s2713_s18  ;;  %p2722_p0 = scmp.lt.s32.totalorder %s2713_s18, %s2713_s18 }
  0x50   : > { %p2716_p11 = pnand %p2714_p10, %p3201_p8  ;;  %p2723_p3 = por %p2722_p0, %p2721_p13 }
  0x52   : > { %p2717_p12 = pneg %p2716_p11 }
  0x54   : > { %p2724_p5 = pnand %p2723_p3, %p2717_p12 }
  0x56   : > { %2727 = shalt.err (!%p2724_p5)
}
  0x57   : > { %s4120_s24 = smov 128   ;;  %s4122_s3 = smov 8  }
  0x58   : > { %2518 = dma.hbm_to_vmem [thread:$0]  (!%p3187_p6), %s4164_s5, 2048, %s3191_s21, [#allocation13], %s4120_s24, %s4120_s24, %s4122_s3  }
  0x59   : > { %s39_s7 = sadd.s32 1, %s3034_s12  ;;  %s42_s16 = sadd.s32 1, %s3038_s13 }
  0x5a   : > { %p40_p1 = scmp.ge.s32.totalorder %s39_s7, 3  ;;  %s51_s23 = sadd.s32 1, %s3022_s9 }
  0x5b   : > { %p58_p2 = scmp.ne.s32.totalorder %s3022_s9, %s3018_s8  ;;  %p4135_p4 = scmp.eq.s32.totalorder %s3042_s14, 0 }
  0x5c   : > { %s4248_s7 = smov (%p40_p1, %s39_s7), 0  ;;  %s4250_s16 = smov (!%p40_p1, %s42_s16), %s3038_s13 }
  0x5d   : > { %4165 = sst [smem:[#allocation31_spill]] %s4248_s7  ;;  %s3256_s20 = ssub.s32 %s3034_s12, %s4248_s7 }
  0x5e   : > { %4166 = sst [smem:[#allocation32_spill]] %s3256_s20  ;;  %p44_p7 = scmp.ge.s32.totalorder %s4250_s16, 3 }
  0x5f   : > { %p64_p9 = scmp.ne.s32.totalorder %s3018_s8, %s3014_s30  ;;  %p3263_p10 = por %p4135_p4, %p58_p2 }
  0x60   : > { %s4252_s16 = smov (%p44_p7, %s4250_s16), 0  ;;  %p4169_p12 = scmp.eq.s32.totalorder %s3173_s15, 0 }
  0x61   : > { %4168 = sst [smem:[#allocation33_spill]] %s4252_s16  ;;  %p4134_p0 = scmp.lt.s32.totalorder %s3042_s14, 9 }
  0x62   : > { %p3272_p13 = por %p4169_p12, %p64_p9  ;;  %s3279_s18 = ssub.s32 %s3038_s13, %s4252_s16 }
  0x63   : > { %s4128_s30 = sand.u32 1, %s3022_s9   ;;  %s48_s25 = sor.u32 %s3256_s20, %s3279_s18 }
  0x64   : > { %s4170_s22 = scalar_select %p3272_p13, 1, 0 }
  0x65   : > { %p49_p5 = scmp.eq.s32.totalorder %s48_s25, 0  ;;  %s3287_s26 = sshll.u32 %s4128_s30, 9 }
  0x66   : > { %4171 = sst [smem:[#allocation34_spill]] %s4170_s22  ;;  %s2134_s24 = sshll.u32 %s3034_s12, 1 }
  0x67   : > { %s2488_s3 = smul.u32 192, %s3038_s13  ;;  %p3300_p1 = pnand %p4134_p0, %p3263_p10 }
  0x68   : > { %s3292_s10 = scalar_select %p49_p5, %s3022_s9, %s51_s23  }
  0x69   : > { %s3294_s11 = sadd.s32 %s2488_s3, %s2134_s24  ;;  %s4138_s30 = sand.u32 1, %s3042_s14  }
  0x6a   : > { %4172 = sst [smem:[#allocation35_spill]] %s3292_s10  ;;  %s4131_s25 = sshll.u32 %s3294_s11, 7 }
  0x6b   : > { %s4174_s1 = sld [smem:[#allocation37_spill]]  ;;  %s322_s24 = scalar_lea.vmem [#allocation6], %s3287_s26 }
  0x6c   : > { %s332_s3 = sshll.u32 %s322_s24, 4  ;;  %s3318_s21 = scalar_lea.sflag [#allocation7], %s4138_s30  ;;  %s3314_s3 = int_to_ptr.vmem [resolvable:$true] %s332_s3 }
  0x6d   : > { %p4142_p7 = pneg %p3300_p1 }
  0x71   : > { %s3311_s23 = scalar_lea.hbm %s4174_s1, %s4131_s25  ;;  %s2733_s25 = scalar_lea.hbm %s4174_s1, 73728 }
  0x72   : > { %s2728_s7 = scalar_lea.hbm %s3311_s23, 8192  ;;  %p2734_p12 = scmp.lt.u32.totalorder %s3311_s23, %s4174_s1 }
  0x73   : > { %p2729_p2 = scmp.ne.s32.totalorder %s3311_s23, %s2728_s7  ;;  %p2735_p5 = scmp.lt.u32.totalorder %s2733_s25, %s2728_s7 }
  0x74   : > { %p2737_p0 = scmp.lt.u32.totalorder %s2728_s7, %s3311_s23 }
  0x75   : > { %p2731_p9 = pnand %p4142_p7, %p2729_p2  ;;  %p2736_p11 = por %p2735_p5, %p2734_p12 }
  0x77   : > { %p2732_p10 = pneg %p2731_p9  ;;  %p2738_p4 = por %p2737_p0, %p2736_p11 }
  0x79   : > { %p2739_p3 = pnand %p2738_p4, %p2732_p10 }
  0x7b   : > { %2742 = shalt.err (!%p2739_p3)
}
  0x7c   : > { %s2743_s24 = scalar_lea.vmem %s3314_s3, 8192  ;;  %s3050_s5 = smov [#allocation6]  }
  0x7d   : > { %p2744_p2 = scmp.ne.s32.totalorder %s3314_s3, %s2743_s24  ;;  %s2748_s16 = sshll.u32 %s3050_s5, 4  ;;  %s2749_s16 = int_to_ptr.vmem [resolvable:$false] %s2748_s16 }
  0x7e   : > { %s2750_s10 = scalar_lea.vmem %s2749_s16, 16384  ;;  %p2751_p6 = scmp.lt.s32.totalorder %s3314_s3, %s2749_s16 }
  0x7f   : > { %p2746_p9 = pnand %p2744_p2, %p4142_p7  ;;  %p2752_p12 = scmp.lt.s32.totalorder %s2750_s10, %s2743_s24 }
  0x81   : > { %p2747_p13 = pneg %p2746_p9  ;;  %p2753_p5 = por %p2752_p12, %p2751_p6 }
  0x83   : > { %p2754_p11 = pnand %p2753_p5, %p2747_p13 }
  0x85   : > { %2757 = shalt.err (!%p2754_p11)
}
  0x86   : > { %s3051_s7 = smov 768   ;;  %s4175_s22 = smov 16  }
  0x87   : > { %s4176_s25 = smov 256   ;;  %s3052_s30 = smov [#allocation14]  }
  0x88   : > { %2528 = dma.hbm_to_vmem [thread:$0]  (!%p3300_p1), %s3311_s23, 8192, %s3314_s3, %s3318_s21, %s3051_s7, %s4176_s25, %s4175_s22  }
  0x89   : > { %s283_s5 = sshll.u32 %s3052_s30, 4  ;;  %s2758_s24 = scalar_lea.hbm %s4111_s6, 16  ;;  %s284_s5 = int_to_ptr.vmem [resolvable:$true] %s283_s5 }
  0x8a   : > { %p2759_p6 = scmp.ne.s32.totalorder %s4111_s6, %s2758_s24  ;;  %p2765_p0 = scmp.lt.u32.totalorder %s2758_s24, %s4111_s6 }
  0x8c   : > { %p2761_p4 = pnand %p2759_p6, %p3201_p8 }
  0x8e   : > { %p2762_p13 = pneg %p2761_p4 }
  0x90   : > { %p2767_p3 = pnand %p2765_p0, %p2762_p13 }
  0x92   : > { %2770 = shalt.err (!%p2767_p3)
}
  0x93   : > { %s2771_s23 = scalar_lea.vmem %s284_s5, 16  ;;  %s2778_s1 = scalar_lea.vmem %s284_s5, 32 }
  0x94   : > { %p2772_p10 = scmp.ne.s32.totalorder %s284_s5, %s2771_s23  ;;  %p2779_p12 = scmp.lt.s32.totalorder %s284_s5, %s284_s5 }
  0x95   : > { %p2780_p5 = scmp.lt.s32.totalorder %s2778_s1, %s2771_s23 }
  0x96   : > { %p2774_p2 = pnand %p2772_p10, %p3201_p8 }
  0x97   : > { %p2781_p11 = por %p2780_p5, %p2779_p12 }
  0x98   : > { %p2775_p9 = pneg %p2774_p2 }
  0x9a   : > { %p2782_p7 = pnand %p2781_p11, %p2775_p9 }
  0x9c   : > { %2785 = shalt.err (!%p2782_p7)
}
  0x9d   : > { %p4177_p6 = scmp.ne.s32.totalorder %s4161_s19, 0  ;;  %s4178_s12 = sshll.u32 %s3294_s11, 7 }
  0x9e   : > { %s4179_s0 = sld [smem:[#allocation36_spill]]  ;;  %s298_s16 = scalar_lea.vmem [#allocation3], %s3287_s26 }
  0x9f   : > { %2521 = dma.hbm_to_vmem [thread:$0]  (!%p4177_p6), %s4111_s6, 16, %s284_s5, [#allocation13]  }
  0xa0   : > { %s308_s19 = sshll.u32 %s298_s16, 4  ;;  %s4180_s24 = sand.u32 1, %s3022_s9   ;;  %s3375_s19 = int_to_ptr.vmem [resolvable:$true] %s308_s19 }
  0xa1   : > { %s3379_s10 = scalar_lea.sflag [#allocation4], %s4180_s24  ;;  %p4181_p7 = pneg %p3300_p1 }
  0xa4   : > { %s3372_s3 = scalar_lea.hbm %s4179_s0, %s4178_s12  ;;  %s2791_s1 = scalar_lea.hbm %s4179_s0, 73728 }
  0xa5   : > { %s2786_s23 = scalar_lea.hbm %s3372_s3, 8192  ;;  %p2792_p0 = scmp.lt.u32.totalorder %s3372_s3, %s4179_s0 }
  0xa6   : > { %p2787_p8 = scmp.ne.s32.totalorder %s3372_s3, %s2786_s23  ;;  %p2793_p3 = scmp.lt.u32.totalorder %s2791_s1, %s2786_s23 }
  0xa7   : > { %p2795_p2 = scmp.lt.u32.totalorder %s2786_s23, %s3372_s3 }
  0xa8   : > { %p2789_p4 = pnand %p2787_p8, %p4181_p7  ;;  %p2794_p10 = por %p2793_p3, %p2792_p0 }
  0xaa   : > { %p2790_p13 = pneg %p2789_p4  ;;  %p2796_p9 = por %p2795_p2, %p2794_p10 }
  0xac   : > { %p2797_p12 = pnand %p2796_p9, %p2790_p13 }
  0xae   : > { %2800 = shalt.err (!%p2797_p12)
}
  0xaf   : > { %s2801_s26 = scalar_lea.vmem %s3375_s19, 8192  ;;  %p4182_p11 = pmov %p4181_p7 }
  0xb0   : > { %p2802_p5 = scmp.ne.s32.totalorder %s3375_s19, %s2801_s26  ;;  %s3053_s12 = smov [#allocation3]  }
  0xb1   : > { %s2806_s17 = sshll.u32 %s3053_s12, 4  ;;  %s2807_s17 = int_to_ptr.vmem [resolvable:$false] %s2806_s17 }
  0xb2   : > { %p2804_p6 = pnand %p2802_p5, %p4182_p11  ;;  %s2808_s20 = scalar_lea.vmem %s2807_s17, 16384 }
  0xb3   : > { %p2809_p7 = scmp.lt.s32.totalorder %s3375_s19, %s2807_s17  ;;  %p2810_p4 = scmp.lt.s32.totalorder %s2808_s20, %s2801_s26 }
  0xb4   : > { %p2805_p8 = pneg %p2804_p6 }
  0xb5   : > { %p2811_p0 = por %p2810_p4, %p2809_p7 }
  0xb7   : > { %p2812_p3 = pnand %p2811_p0, %p2805_p8 }
  0xb9   : > { %2815 = shalt.err (!%p2812_p3)
}
  0xba   : > { %2525 = dma.hbm_to_vmem [thread:$0]  (!%p3300_p1), %s3372_s3, 8192, %s3375_s19, %s3379_s10, %s3051_s7, %s4176_s25, %s4175_s22  }
  0xbb   : > { %s2126_s4 = sadd.s32 4294967294, %s3042_s14   ;;  %s105_s16 = sadd.s32 1, %s3010_s29 }
  0xbc   : > { %p112_p13 = scmp.ne.s32.totalorder %s3010_s29, %s3006_s28  ;;  %p4183_p10 = scmp.eq.s32.totalorder %s3279_s18, 0 }
  0xbd   : > { %p4184_p2 = scmp.eq.s32.totalorder %s3042_s14, 0  ;;  %p118_p12 = scmp.ne.s32.totalorder %s3006_s28, %s3002_s27 }
  0xbe   : > { %s3415_s24 = scalar_select %p4183_p10, %s3010_s29, %s105_s16  }
  0xbf   : > { %p3419_p9 = por %p112_p13, %p4184_p2  ;;  %p4186_p5 = scmp.eq.s32.totalorder %s3173_s15, 8 }
  0xc0   : > { %p237_p1 = scmp.eq.s32.totalorder %s2126_s4, 8  ;;  %p4188_p6 = scmp.eq.s32.totalorder %s3173_s15, 0 }
  0xc1   : > { %p3427_p11 = por %p4186_p5, %p112_p13  ;;  %s344_s18 = sand.u32 1, %s3010_s29  }
  0xc2   : > { %p3433_p8 = por %p118_p12, %p4188_p6  ;;  %p3438_p7 = por %p237_p1, %p118_p12 }
  0xc3   : > { %s4187_s11 = scalar_select %p3427_p11, 1, 0 }
  0xc4   : > { %s4190_s22 = scalar_select %p3438_p7, 1, 0 }
  0xc5   : > { %s2142_s25 = sshll.u32 %s344_s18, 8  ;;  %s2165_s3 = sshll.u32 %s3038_s13, 12 }
  0xc6   : > { %s4191_s2 = sld [smem:[#allocation38_spill]]  ;;  %s346_s1 = scalar_lea.vmem [#allocation8], %s2142_s25 }
  0xc7   : > { %s353_s8 = sshll.u32 %s346_s1, 4  ;;  %p4192_p4 = scmp.lt.s32.totalorder %s3042_s14, 9  ;;  %s3448_s8 = int_to_ptr.vmem [resolvable:$true] %s353_s8 }
  0xc9   : > { %p3454_p0 = pnand %p4192_p4, %p3419_p9 }
  0xcb   : > { %p2818_p13 = pneg %p3454_p0 }
  0xcc   : > { %s3446_s5 = scalar_lea.hbm %s4191_s2, %s2165_s3  ;;  %s2821_s20 = scalar_lea.hbm %s4191_s2, 12288 }
  0xcd   : > { %s2816_s26 = scalar_lea.hbm %s3446_s5, 4096  ;;  %p2822_p9 = scmp.lt.u32.totalorder %s3446_s5, %s4191_s2 }
  0xce   : > { %p2817_p3 = scmp.ne.s32.totalorder %s3446_s5, %s2816_s26  ;;  %p2823_p12 = scmp.lt.u32.totalorder %s2821_s20, %s2816_s26 }
  0xcf   : > { %p2825_p1 = scmp.lt.u32.totalorder %s2816_s26, %s3446_s5 }
  0xd0   : > { %p2819_p10 = pnand %p2818_p13, %p2817_p3  ;;  %p2824_p5 = por %p2823_p12, %p2822_p9 }
  0xd2   : > { %p2820_p2 = pneg %p2819_p10  ;;  %p2826_p6 = por %p2825_p1, %p2824_p5 }
  0xd4   : > { %p2827_p4 = pnand %p2826_p6, %p2820_p2 }
  0xd6   : > { %2830 = shalt.err (!%p2827_p4)
}
  0xd7   : > { %s2831_s23 = scalar_lea.vmem %s3448_s8, 4096  ;;  %s3054_s18 = smov [#allocation8]  }
  0xd8   : > { %p2832_p3 = scmp.ne.s32.totalorder %s3448_s8, %s2831_s23  ;;  %s2836_s25 = sshll.u32 %s3054_s18, 4  ;;  %s2837_s25 = int_to_ptr.vmem [resolvable:$false] %s2836_s25 }
  0xd9   : > { %s2838_s3 = scalar_lea.vmem %s2837_s25, 8192  ;;  %p2839_p11 = scmp.lt.s32.totalorder %s3448_s8, %s2837_s25 }
  0xda   : > { %p2834_p10 = pnand %p2832_p3, %p2818_p13  ;;  %p2840_p9 = scmp.lt.s32.totalorder %s2838_s3, %s2831_s23 }
  0xdc   : > { %p2835_p7 = pneg %p2834_p10  ;;  %p2841_p12 = por %p2840_p9, %p2839_p11 }
  0xde   : > { %p2842_p5 = pnand %p2841_p12, %p2835_p7 }
  0xe0   : > { %2845 = shalt.err (!%p2842_p5)
}
  0xe1   : > { %s4194_s19 = smov 8   ;;  %s4195_s10 = smov 128  }
  0xe2   : > { %s4196_s1 = sld [smem:[#allocation25_spill]]  ;;  %s4197_s26 = sld [smem:[#allocation32_spill]] }
  0xe3   : > { %s4198_s12 = sld [smem:[#allocation24_spill]]  ;;  %s4199_s17 = sld [smem:[#allocation23_spill]] }
  0xe4   : > { %s4200_s20 = sld [smem:[#allocation29_spill]]  ;;  %p4202_p2 = scmp.eq.s32.totalorder %s3042_s14, 0 }
  0xe5   : > { %2531 = dma.hbm_to_vmem [thread:$0]  (!%p3454_p0), %s3446_s5, 4096, %s3448_s8, %s3318_s21, %s4195_s10, %s4195_s10, %s4194_s19  }
  0xe6   : > { %p4203_p6 = scmp.eq.s32.totalorder %s3173_s15, 0  ;;  %s4205_s2 = sld [smem:[#allocation39_spill]] }
  0xe7   : > { %p4206_p0 = scmp.lt.s32.totalorder %s3042_s14, 9 }
  0xe8   : > { %s131_s30 = sadd.s32 1, %s4196_s1  ;;  %p4201_p11 = scmp.eq.s32.totalorder %s4197_s26, 0 }
  0xe9   : > { %p138_p7 = scmp.ne.s32.totalorder %s4196_s1, %s4198_s12  ;;  %p144_p13 = scmp.ne.s32.totalorder %s4198_s12, %s4199_s17 }
  0xea   : > { %s3491_s4 = scalar_select %p4201_p11, %s4196_s1, %s131_s30  }
  0xeb   : > { %s365_s16 = sand.u32 1, %s4196_s1   ;;  %p140_p1 = por %p138_p7, %p4202_p2 }
  0xec   : > { %p3502_p4 = por %p144_p13, %p4203_p6  ;;  %s2145_s18 = sshll.u32 %s365_s16, 8 }
  0xed   : > { %s2166_s25 = sshll.u32 %s4200_s20, 12  ;;  %s367_s5 = scalar_lea.vmem [#allocation9], %s2145_s18 }
  0xee   : > { %s4204_s23 = scalar_select %p3502_p4, 1, 0 }
  0xef   : > { %s3510_s21 = scalar_lea.hbm %s4205_s2, %s2166_s25  ;;  %s374_s8 = sshll.u32 %s367_s5, 4  ;;  %s3518_s8 = int_to_ptr.vmem [resolvable:$true] %s374_s8 }
  0xf0   : > { %p3514_p3 = pnand %p4206_p0, %p140_p1  ;;  %s4208_s26 = sand.u32 1, %s3042_s14  }
  0xf1   : > { %s3522_s12 = scalar_lea.sflag [#allocation10], %s4208_s26  ;;  %s2846_s0 = scalar_lea.hbm %s3510_s21, 4096 }
  0xf2   : > { %p2847_p10 = scmp.ne.s32.totalorder %s3510_s21, %s2846_s0  ;;  %p2848_p9 = pneg %p3514_p3 }
  0xf3   : > { %s2851_s30 = scalar_lea.hbm %s4205_s2, 12288  ;;  %p2852_p11 = scmp.lt.u32.totalorder %s3510_s21, %s4205_s2 }
  0xf4   : > { %p2849_p12 = pnand %p2848_p9, %p2847_p10  ;;  %p2853_p7 = scmp.lt.u32.totalorder %s2851_s30, %s2846_s0 }
  0xf5   : > { %p2855_p2 = scmp.lt.u32.totalorder %s2846_s0, %s3510_s21 }
  0xf6   : > { %p2850_p5 = pneg %p2849_p12  ;;  %p2854_p13 = por %p2853_p7, %p2852_p11 }
  0xf8   : > { %p2856_p1 = por %p2855_p2, %p2854_p13 }
  0xfa   : > { %p2857_p6 = pnand %p2856_p1, %p2850_p5 }
  0xfc   : > { %2860 = shalt.err (!%p2857_p6)
}
  0xfd   : > { %s2861_s25 = scalar_lea.vmem %s3518_s8, 4096  ;;  %s3055_s3 = smov [#allocation9]  }
  0xfe   : > { %p2862_p0 = scmp.ne.s32.totalorder %s3518_s8, %s2861_s25  ;;  %s2866_s5 = sshll.u32 %s3055_s3, 4  ;;  %s2867_s5 = int_to_ptr.vmem [resolvable:$false] %s2866_s5 }
  0xff   : > { %s2868_s26 = scalar_lea.vmem %s2867_s5, 8192  ;;  %p2869_p4 = scmp.lt.s32.totalorder %s3518_s8, %s2867_s5 }
 0x100   : > { %p2864_p10 = pnand %p2862_p0, %p2848_p9  ;;  %p2870_p11 = scmp.lt.s32.totalorder %s2868_s26, %s2861_s25 }
 0x102   : > { %p2865_p12 = pneg %p2864_p10  ;;  %p2871_p7 = por %p2870_p11, %p2869_p4 }
 0x104   : > { %p2872_p13 = pnand %p2871_p7, %p2865_p12 }
 0x106   : > { %2875 = shalt.err (!%p2872_p13)
}
 0x107   : > { %2534 = dma.hbm_to_vmem [thread:$0]  (!%p3514_p3), %s3510_s21, 4096, %s3518_s8, %s3522_s12, %s4195_s10, %s4195_s10, %s4194_s19  }
 0x108   : > { %s4209_s0 = sld [smem:[#allocation30_spill]] }
 0x10e   : > { %p4210_p9 = scmp.ne.s32.totalorder %s4209_s0, 0 }
 0x10f   : > { %s4211_s17 = sld [smem:[#allocation26_spill]] (!%p4210_p9)  ;;  %s4212_s20 = sld [smem:[#allocation34_spill]] (!%p4210_p9) }
 0x110   : > { %386 = sbr.rel (%p4210_p9) target bundleno = 1288 (0x508), region = 48 }
 0x115   : > { %s388_s30 = sand.u32 (!%p4210_p9), 1, %s4211_s17   ;;  %p4213_p4 = scmp.ne.s32.totalorder (!%p4210_p9), %s4212_s20, 0 }
 0x116   : > { %s2149_s16 = sshll.u32 (!%p4210_p9), %s388_s30, 9  ;;  %s389_s18 = scalar_lea.sflag (!%p4210_p9), [#allocation4], %s388_s30 }
 0x117   : > { %s3556_s25 = scalar_lea.vmem [#allocation3], %s2149_s16 }
 0x118   : > { %2961 = dma.done.wait (%p4213_p4), %s389_s18, 8192  }
 0x119   : > { %2963 = vsyncadd (%p4213_p4), %s389_s18, 4294959104  ;;  %s397_s1 = sand.u32 1, %s3173_s15   ;;  %s3563_s19 = scalar_lea.vmem [#allocation6], %s2149_s16 }
 0x11a   : > { %s398_s3 = scalar_lea.sflag [#allocation7], %s397_s1 }
 0x11b   : > { %2965 = dma.done.wait (%p4213_p4), %s398_s3, 8192  }
 0x11c   : > { %2967 = vsyncadd (%p4213_p4), %s398_s3, 4294959104  ;;  %s408_s10 = sand.u32 1, %s3006_s28  }
 0x11d   : > { %s2151_s21 = sshll.u32 %s408_s10, 8 }
 0x11e   : > { %s3572_s8 = scalar_lea.vmem [#allocation8], %s2151_s21 }
 0x11f   : > { %2969 = dma.done.wait (%p3433_p8), %s398_s3, 4096  }
 0x120   : > { %2971 = vsyncadd (%p3433_p8), %s398_s3, 4294963200  ;;  %s4214_s12 = sld [smem:[#allocation24_spill]]  ;;  %s416_s0 = scalar_lea.sflag [#allocation10], %s397_s1 }
 0x121   : > { %p4215_p3 = scmp.ne.s32.totalorder %s4204_s23, 0 }
 0x126   : > { %s417_s5 = sand.u32 1, %s4214_s12  }
 0x127   : > { %s2152_s26 = sshll.u32 %s417_s5, 8 }
 0x128   : > { %s3579_s17 = scalar_lea.vmem [#allocation9], %s2152_s26 }
 0x129   : > { %2973 = dma.done.wait (%p4215_p3), %s416_s0, 4096  }
 0x12a   : > { %2975 = vsyncadd (%p4215_p3), %s416_s0, 4294963200  ;;  %p4216_p5 = scmp.eq.s32.totalorder %s3173_s15, 0 }
 0x12c   : > { %2977 = dma.done.wait (%p4216_p5), [#allocation10], 4096   ;;  %p4217_p2 = pmov %p4216_p5 }
 0x12e   : > { %2979 = vsyncadd (%p4217_p2), [#allocation10], 4294963200  ;;  %p4218_p8 = pmov %p4217_p2 }
 0x12f   : > { %p4219_p1 = pmov %p4217_p2 }
 0x130   : > { %2981 = dma.done.wait (%p4218_p8), [#allocation13], 2064  }
 0x131   : > { %2983 = vsyncadd (%p4219_p1), [#allocation13], 4294965232  ;;  %s3593_s7 = scalar_lea.vmem [#allocation15], %s2151_s21  ;;  %s4220_s20 = sld [smem:[#allocation27_spill]] }
 0x137   : > { %p2157_p6 = scmp.ne.s32.totalorder %s4220_s20, 0 }
 0x138   : > { %v3056_v0 = vmov (!%p2157_p6), 0.0  }
 0x139   : > { %487 = sbr.rel (%p2157_p6) target bundleno = 329 (0x149), region = 80  ;;  %488 = vst [vmem:[#allocation2] sm:$0xff] (!%p2157_p6), %v3056_v0  ;;  %489 = vst [vmem:[#allocation2 + $0x8] sm:$0xff] (!%p2157_p6), %v3056_v0 }
 0x13a   : > { %490 = vst [vmem:[#allocation2 + $0x10] sm:$0xff] (!%p2157_p6), %v3056_v0  ;;  %491 = vst [vmem:[#allocation2 + $0x18] sm:$0xff] (!%p2157_p6), %v3056_v0 }
 0x13b   : > { %492 = vst [vmem:[#allocation2 + $0x20] sm:$0xff] (!%p2157_p6), %v3056_v0  ;;  %493 = vst [vmem:[#allocation2 + $0x28] sm:$0xff] (!%p2157_p6), %v3056_v0 }
 0x13c   : > { %494 = vst [vmem:[#allocation2 + $0x30] sm:$0xff] (!%p2157_p6), %v3056_v0  ;;  %495 = vst [vmem:[#allocation2 + $0x38] sm:$0xff] (!%p2157_p6), %v3056_v0 }
 0x13d   : > { %496 = vst [vmem:[#allocation2 + $0x40] sm:$0xff] (!%p2157_p6), %v3056_v0  ;;  %497 = vst [vmem:[#allocation2 + $0x48] sm:$0xff] (!%p2157_p6), %v3056_v0 }
 0x13e   : > { %498 = vst [vmem:[#allocation2 + $0x50] sm:$0xff] (!%p2157_p6), %v3056_v0  ;;  %499 = vst [vmem:[#allocation2 + $0x58] sm:$0xff] (!%p2157_p6), %v3056_v0 }
 0x13f   : > { %500 = vst [vmem:[#allocation2 + $0x60] sm:$0xff] (!%p2157_p6), %v3056_v0  ;;  %501 = vst [vmem:[#allocation2 + $0x68] sm:$0xff] (!%p2157_p6), %v3056_v0 }
 0x140   : > { %502 = vst [vmem:[#allocation2 + $0x70] sm:$0xff] %v3056_v0  ;;  %503 = vst [vmem:[#allocation2 + $0x78] sm:$0xff] %v3056_v0 }
 0x141   : > { %504 = vst [vmem:[#allocation2 + $0x80] sm:$0xff] %v3056_v0  ;;  %505 = vst [vmem:[#allocation2 + $0x88] sm:$0xff] %v3056_v0 }
 0x142   : > { %506 = vst [vmem:[#allocation2 + $0x90] sm:$0xff] %v3056_v0  ;;  %507 = vst [vmem:[#allocation2 + $0x98] sm:$0xff] %v3056_v0 }
 0x143   : > { %508 = vst [vmem:[#allocation2 + $0xa0] sm:$0xff] %v3056_v0  ;;  %509 = vst [vmem:[#allocation2 + $0xa8] sm:$0xff] %v3056_v0 }
 0x144   : > { %510 = vst [vmem:[#allocation2 + $0xb0] sm:$0xff] %v3056_v0  ;;  %511 = vst [vmem:[#allocation2 + $0xb8] sm:$0xff] %v3056_v0 }
 0x145   : > { %512 = vst [vmem:[#allocation2 + $0xc0] sm:$0xff] %v3056_v0  ;;  %513 = vst [vmem:[#allocation2 + $0xc8] sm:$0xff] %v3056_v0 }
 0x146   : > { %514 = vst [vmem:[#allocation2 + $0xd0] sm:$0xff] %v3056_v0  ;;  %515 = vst [vmem:[#allocation2 + $0xd8] sm:$0xff] %v3056_v0 }
 0x147   : > { %516 = vst [vmem:[#allocation2 + $0xe0] sm:$0xff] %v3056_v0  ;;  %517 = vst [vmem:[#allocation2 + $0xe8] sm:$0xff] %v3056_v0 }
 0x148   : > { %518 = vst [vmem:[#allocation2 + $0xf0] sm:$0xff] %v3056_v0  ;;  %519 = vst [vmem:[#allocation2 + $0xf8] sm:$0xff] %v3056_v0 }
 0x149 PF: > { %v681_v1 = vld [vmem:[#allocation11 + $0x8] sm:$0xff]  ;;  %v683_v2 = vld [vmem:[#allocation11 + $0x18] sm:$0xff]  ;;  %v680_v3 = vld [vmem:[#allocation11] sm:$0xff]  ;;  %v3057_v8 = vmov 0.0   ;;  %s4221_s15 = sld [smem:[#allocation27_spill]] }
 0x14a   : > { %v2296_v4 = vpack.c.bf16 %v683_v2, %v681_v1  ;;  %v682_v5 = vld [vmem:[#allocation11 + $0x10] sm:$0xff]  ;;  %v685_v6 = vld [vmem:[#allocation11 + $0x28] sm:$0xff]  ;;  %v687_v7 = vld [vmem:[#allocation11 + $0x38] sm:$0xff]  ;;  %776 = vmatprep.mubr.f32.mxu0 %v3057_v8  ;;  %872 = vmatprep.mubr.f32.mxu1 %v3057_v8 }
 0x14b   : > { %v2298_v9 = vpack.c.bf16 %v682_v5, %v680_v3  ;;  %v2300_v10 = vpack.c.bf16 %v687_v7, %v685_v6  ;;  %v684_v11 = vld [vmem:[#allocation11 + $0x20] sm:$0xff]  ;;  %v686_v12 = vld [vmem:[#allocation11 + $0x30] sm:$0xff]  ;;  %v689_v13 = vld [vmem:[#allocation11 + $0x48] sm:$0xff] }
 0x14c   : > { %2297 = vmatprep.subr.bf16.mxu0 %v2296_v4  ;;  %v691_v14 = vld [vmem:[#allocation11 + $0x58] sm:$0xff]  ;;  %2456 = vmatprep.subr.bf16.mxu1 %v2296_v4  ;;  %v2302_v15 = vpack.c.bf16 %v686_v12, %v684_v11  ;;  %v688_v17 = vld [vmem:[#allocation11 + $0x40] sm:$0xff]  ;;  %v690_v18 = vld [vmem:[#allocation11 + $0x50] sm:$0xff] }
 0x14d   : > { %2299 = vmatpush1.bf16.msra.mxu0 %v2298_v9  ;;  %2464 = vmatpush1.bf16.msra.mxu1 %v2298_v9  ;;  %v2304_v16 = vpack.c.bf16 %v691_v14, %v689_v13  ;;  %v693_v19 = vld [vmem:[#allocation11 + $0x68] sm:$0xff]  ;;  %v695_v20 = vld [vmem:[#allocation11 + $0x78] sm:$0xff]  ;;  %v2306_v21 = vpack.c.bf16 %v690_v18, %v688_v17  ;;  %v692_v23 = vld [vmem:[#allocation11 + $0x60] sm:$0xff] }
 0x14e   : > { %2301 = vmatprep.subr.bf16.mxu0 %v2300_v10  ;;  %2457 = vmatprep.subr.bf16.mxu1 %v2300_v10  ;;  %v2308_v22 = vpack.c.bf16 %v695_v20, %v693_v19  ;;  %v694_v24 = vld [vmem:[#allocation11 + $0x70] sm:$0xff]  ;;  %v697_v25 = vld [vmem:[#allocation11 + $0x88] sm:$0xff]  ;;  %v699_v26 = vld [vmem:[#allocation11 + $0x98] sm:$0xff]  ;;  %v3058_v19 = vmov 0.0|0.0  }
 0x14f   : > { %v2310_v27 = vpack.c.bf16 %v694_v24, %v692_v23  ;;  %v2312_v28 = vpack.c.bf16 %v699_v26, %v697_v25  ;;  %v696_v29 = vld [vmem:[#allocation11 + $0x80] sm:$0xff]  ;;  %v698_v30 = vld [vmem:[#allocation11 + $0x90] sm:$0xff]  ;;  %v701_v31 = vld [vmem:[#allocation11 + $0xa8] sm:$0xff]  ;;  %p2158_p0 = scmp.ne.s32.totalorder %s4221_s15, 2 }
 0x150   : > { %v703_v32 = vld [vmem:[#allocation11 + $0xb8] sm:$0xff]  ;;  %v2314_v33 = vpack.c.bf16 %v698_v30, %v696_v29  ;;  %v700_v35 = vld [vmem:[#allocation11 + $0xa0] sm:$0xff]  ;;  %v702_v36 = vld [vmem:[#allocation11 + $0xb0] sm:$0xff] }
 0x151   : > { %2303 = vmatpush1.bf16.msra.mxu0 %v2302_v15  ;;  %2465 = vmatpush1.bf16.msra.mxu1 %v2302_v15  ;;  %v2316_v34 = vpack.c.bf16 %v703_v32, %v701_v31  ;;  %v705_v37 = vld [vmem:[#allocation11 + $0xc8] sm:$0xff]  ;;  %v707_v38 = vld [vmem:[#allocation11 + $0xd8] sm:$0xff]  ;;  %v2318_v39 = vpack.c.bf16 %v702_v36, %v700_v35  ;;  %v704_v41 = vld [vmem:[#allocation11 + $0xc0] sm:$0xff] }
 0x152   : > { %2305 = vmatprep.subr.bf16.mxu0 %v2304_v16  ;;  %2458 = vmatprep.subr.bf16.mxu1 %v2304_v16  ;;  %v2320_v40 = vpack.c.bf16 %v707_v38, %v705_v37  ;;  %v706_v42 = vld [vmem:[#allocation11 + $0xd0] sm:$0xff]  ;;  %v709_v43 = vld [vmem:[#allocation11 + $0xe8] sm:$0xff]  ;;  %v711_v44 = vld [vmem:[#allocation11 + $0xf8] sm:$0xff] }
 0x153   : > { %v2322_v45 = vpack.c.bf16 %v706_v42, %v704_v41  ;;  %v2324_v46 = vpack.c.bf16 %v711_v44, %v709_v43  ;;  %v708_v47 = vld [vmem:[#allocation11 + $0xe0] sm:$0xff]  ;;  %v710_v48 = vld [vmem:[#allocation11 + $0xf0] sm:$0xff]  ;;  %v649_v52 = vld [vmem:[%s3579_s17 + $0x8] sm:$0xff] }
 0x154   : > { %v2326_v49 = vpack.c.bf16 %v710_v48, %v708_v47  ;;  %v648_v50 = vld [vmem:[%s3579_s17] sm:$0xff]  ;;  %v665_v53 = vld [vmem:[%s3579_s17 + $0x88] sm:$0xff]  ;;  %v650_v54 = vld [vmem:[%s3579_s17 + $0x10] sm:$0xff] }
 0x155   : > { %2307 = vmatpush1.bf16.msra.mxu0 %v2306_v21  ;;  %2466 = vmatpush1.bf16.msra.mxu1 %v2306_v21  ;;  %v664_v51 = vld [vmem:[%s3579_s17 + $0x80] sm:$0xff]  ;;  %v666_v55 = vld [vmem:[%s3579_s17 + $0x90] sm:$0xff]  ;;  %v651_v56 = vld [vmem:[%s3579_s17 + $0x18] sm:$0xff] }
 0x156   : > { %2309 = vmatprep.subr.bf16.mxu0 %v2308_v22  ;;  %2459 = vmatprep.subr.bf16.mxu1 %v2308_v22  ;;  %v667_v57 = vld [vmem:[%s3579_s17 + $0x98] sm:$0xff]  ;;  %v652_v58 = vld [vmem:[%s3579_s17 + $0x20] sm:$0xff]  ;;  %v653_v60 = vld [vmem:[%s3579_s17 + $0x28] sm:$0xff] }
 0x157   : > { %v668_v59 = vld [vmem:[%s3579_s17 + $0xa0] sm:$0xff]  ;;  %v669_v61 = vld [vmem:[%s3579_s17 + $0xa8] sm:$0xff]  ;;  %v654_v62 = vld [vmem:[%s3579_s17 + $0x30] sm:$0xff] }
 0x158   : > { %v670_v63 = vld [vmem:[%s3579_s17 + $0xb0] sm:$0xff]  ;;  %v655_v0 = vld [vmem:[%s3579_s17 + $0x38] sm:$0xff]  ;;  %v656_v2 = vld [vmem:[%s3579_s17 + $0x40] sm:$0xff] }
 0x159   : > { %2311 = vmatpush1.bf16.msra.mxu0 %v2310_v27  ;;  %2467 = vmatpush1.bf16.msra.mxu1 %v2310_v27  ;;  %v671_v1 = vld [vmem:[%s3579_s17 + $0xb8] sm:$0xff]  ;;  %v672_v3 = vld [vmem:[%s3579_s17 + $0xc0] sm:$0xff]  ;;  %v657_v4 = vld [vmem:[%s3579_s17 + $0x48] sm:$0xff] }
 0x15a   : > { %2313 = vmatprep.subr.bf16.mxu0 %v2312_v28  ;;  %2460 = vmatprep.subr.bf16.mxu1 %v2312_v28  ;;  %v673_v5 = vld [vmem:[%s3579_s17 + $0xc8] sm:$0xff]  ;;  %v658_v6 = vld [vmem:[%s3579_s17 + $0x50] sm:$0xff]  ;;  %v659_v9 = vld [vmem:[%s3579_s17 + $0x58] sm:$0xff] }
 0x15b   : > { %v674_v7 = vld [vmem:[%s3579_s17 + $0xd0] sm:$0xff]  ;;  %v675_v10 = vld [vmem:[%s3579_s17 + $0xd8] sm:$0xff]  ;;  %v660_v11 = vld [vmem:[%s3579_s17 + $0x60] sm:$0xff] }
 0x15c   : > { %v676_v12 = vld [vmem:[%s3579_s17 + $0xe0] sm:$0xff]  ;;  %v661_v13 = vld [vmem:[%s3579_s17 + $0x68] sm:$0xff]  ;;  %v662_v15 = vld [vmem:[%s3579_s17 + $0x70] sm:$0xff] }
 0x15d   : > { %2315 = vmatpush1.bf16.msra.mxu0 %v2314_v33  ;;  %2468 = vmatpush1.bf16.msra.mxu1 %v2314_v33  ;;  %v677_v14 = vld [vmem:[%s3579_s17 + $0xe8] sm:$0xff]  ;;  %v678_v16 = vld [vmem:[%s3579_s17 + $0xf0] sm:$0xff]  ;;  %v663_v17 = vld [vmem:[%s3579_s17 + $0x78] sm:$0xff] }
 0x15e   : > { %2317 = vmatprep.subr.bf16.mxu0 %v2316_v34  ;;  %2461 = vmatprep.subr.bf16.mxu1 %v2316_v34  ;;  %v679_v18 = vld [vmem:[%s3579_s17 + $0xf8] sm:$0xff]  ;;  %v585_v20 = vld [vmem:[%s3563_s19 + $0x8] sm:$0xff] }
 0x15f   : > { %v521_v21 = vld [vmem:[%s3556_s25 + $0x8] sm:$0xff] }
 0x161   : > { %2319 = vmatpush1.bf16.msra.mxu0 %v2318_v39  ;;  %2469 = vmatpush1.bf16.msra.mxu1 %v2318_v39 }
 0x162   : > { %2321 = vmatprep.subr.bf16.mxu0 %v2320_v40  ;;  %2462 = vmatprep.subr.bf16.mxu1 %v2320_v40 }
 0x165   : > { %2323 = vmatpush1.bf16.msra.mxu0 %v2322_v45  ;;  %2470 = vmatpush1.bf16.msra.mxu1 %v2322_v45 }
 0x166   : > { %2325 = vmatprep.subr.bf16.mxu0 %v2324_v46  ;;  %2463 = vmatprep.subr.bf16.mxu1 %v2324_v46 }
 0x169   : > { %2327 = vmatpush1.bf16.msra.mxu0 %v2326_v49  ;;  %2471 = vmatpush1.bf16.msra.mxu1 %v2326_v49 }
 0x16a   : > { %2376 = vmatprep.subr.bf16.mxu0 %v3058_v19  ;;  %2328 = vmatprep.subr.bf16.mxu1 %v3058_v19 }
 0x16c   : > { %777 = vmatmul.mubr.f32.vlgmr.msra.gmra.mrb[0].mxu0 %v648_v50  ;;  %873 = vmatmul.mubr.f32.vlgmr.msra.gmra.mrb[0].mxu1 %v664_v51 }
 0x16d   : > { %782 = vmatprep.mubr.f32.mxu0 %v3057_v8  ;;  %878 = vmatprep.mubr.f32.mxu1 %v3057_v8 }
 0x170   : > { %783 = vmatmul.mubr.f32.gmra.mrb[2].mxu0 %v649_v52  ;;  %879 = vmatmul.mubr.f32.gmra.mrb[2].mxu1 %v665_v53 }
 0x171   : > { %788 = vmatprep.mubr.f32.mxu0 %v3057_v8  ;;  %884 = vmatprep.mubr.f32.mxu1 %v3057_v8 }
 0x174   : > { %789 = vmatmul.mubr.f32.gmra.mrb[4].mxu0 %v650_v54  ;;  %885 = vmatmul.mubr.f32.gmra.mrb[4].mxu1 %v666_v55 }
 0x175   : > { %794 = vmatprep.mubr.f32.mxu0 %v3057_v8  ;;  %890 = vmatprep.mubr.f32.mxu1 %v3057_v8 }
 0x178   : > { %795 = vmatmul.mubr.f32.gmra.mrb[6].mxu0 %v651_v56  ;;  %891 = vmatmul.mubr.f32.gmra.mrb[6].mxu1 %v667_v57 }
 0x179   : > { %800 = vmatprep.mubr.f32.mxu0 %v3057_v8  ;;  %896 = vmatprep.mubr.f32.mxu1 %v3057_v8 }
 0x17c   : > { %801 = vmatmul.mubr.f32.gmra.mrb[8].mxu0 %v652_v58  ;;  %897 = vmatmul.mubr.f32.gmra.mrb[8].mxu1 %v668_v59 }
 0x17d   : > { %806 = vmatprep.mubr.f32.mxu0 %v3057_v8  ;;  %902 = vmatprep.mubr.f32.mxu1 %v3057_v8 }
 0x180   : > { %807 = vmatmul.mubr.f32.gmra.mrb[10].mxu0 %v653_v60  ;;  %903 = vmatmul.mubr.f32.gmra.mrb[10].mxu1 %v669_v61 }
 0x181   : > { %812 = vmatprep.mubr.f32.mxu0 %v3057_v8  ;;  %908 = vmatprep.mubr.f32.mxu1 %v3057_v8 }
 0x184   : > { %813 = vmatmul.mubr.f32.gmra.mrb[12].mxu0 %v654_v62  ;;  %909 = vmatmul.mubr.f32.gmra.mrb[12].mxu1 %v670_v63 }
 0x185   : > { %818 = vmatprep.mubr.f32.mxu0 %v3057_v8  ;;  %914 = vmatprep.mubr.f32.mxu1 %v3057_v8 }
 0x188   : > { %819 = vmatmul.mubr.f32.gmra.mrb[14].mxu0 %v655_v0  ;;  %915 = vmatmul.mubr.f32.gmra.mrb[14].mxu1 %v671_v1 }
 0x189   : > { %824 = vmatprep.mubr.f32.mxu0 %v3057_v8  ;;  %920 = vmatprep.mubr.f32.mxu1 %v3057_v8 }
 0x18c   : > { %825 = vmatmul.mubr.f32.gmra.mrb[16].mxu0 %v656_v2  ;;  %921 = vmatmul.mubr.f32.gmra.mrb[16].mxu1 %v672_v3 }
 0x18d   : > { %830 = vmatprep.mubr.f32.mxu0 %v3057_v8  ;;  %926 = vmatprep.mubr.f32.mxu1 %v3057_v8 }
 0x190   : > { %831 = vmatmul.mubr.f32.gmra.mrb[18].mxu0 %v657_v4  ;;  %927 = vmatmul.mubr.f32.gmra.mrb[18].mxu1 %v673_v5 }
 0x191   : > { %836 = vmatprep.mubr.f32.mxu0 %v3057_v8  ;;  %932 = vmatprep.mubr.f32.mxu1 %v3057_v8 }
 0x194   : > { %837 = vmatmul.mubr.f32.gmra.mrb[20].mxu0 %v658_v6  ;;  %933 = vmatmul.mubr.f32.gmra.mrb[20].mxu1 %v674_v7 }
 0x195   : > { %842 = vmatprep.mubr.f32.mxu0 %v3057_v8  ;;  %938 = vmatprep.mubr.f32.mxu1 %v3057_v8 }
 0x198   : > { %843 = vmatmul.mubr.f32.gmra.mrb[22].mxu0 %v659_v9  ;;  %939 = vmatmul.mubr.f32.gmra.mrb[22].mxu1 %v675_v10 }
 0x199   : > { %848 = vmatprep.mubr.f32.mxu0 %v3057_v8  ;;  %944 = vmatprep.mubr.f32.mxu1 %v3057_v8 }
 0x19c   : > { %849 = vmatmul.mubr.f32.gmra.mrb[24].mxu0 %v660_v11  ;;  %945 = vmatmul.mubr.f32.gmra.mrb[24].mxu1 %v676_v12 }
 0x19d   : > { %854 = vmatprep.mubr.f32.mxu0 %v3057_v8  ;;  %950 = vmatprep.mubr.f32.mxu1 %v3057_v8 }
 0x1a0   : > { %855 = vmatmul.mubr.f32.gmra.mrb[26].mxu0 %v661_v13  ;;  %951 = vmatmul.mubr.f32.gmra.mrb[26].mxu1 %v677_v14 }
 0x1a1   : > { %860 = vmatprep.mubr.f32.mxu0 %v3057_v8  ;;  %956 = vmatprep.mubr.f32.mxu1 %v3057_v8 }
 0x1a4   : > { %861 = vmatmul.mubr.f32.gmra.mrb[28].mxu0 %v662_v15  ;;  %957 = vmatmul.mubr.f32.gmra.mrb[28].mxu1 %v678_v16 }
 0x1a5   : > { %866 = vmatprep.mubr.f32.mxu0 %v3057_v8  ;;  %962 = vmatprep.mubr.f32.mxu1 %v3057_v8 }
 0x1a8   : > { %867 = vmatmul.mubr.f32.gmra.mrb[30].mxu0 %v663_v17  ;;  %963 = vmatmul.mubr.f32.gmra.mrb[30].mxu1 %v679_v18 }
 0x1a9   : > { %1065 = vmatprep.mubr.f32.mxu1 %v585_v20  ;;  %1290 = vmatprep.mubr.f32.mxu0 %v521_v21 }
 0x23f   : > { %v778_v22 = vpop.f32.mrb[0].mxu0  ;;  %v3664_v23 = vpop.f32.mrb[0].mxu1 }
 0x240   : > { %v780_v24 = vpop.f32.mrb[1].mxu0  ;;  %v3666_v25 = vpop.f32.mrb[1].mxu1 }
 0x243   : > { %v784_v26 = vpop.f32.mrb[2].mxu0  ;;  %v3668_v8 = vpop.f32.mrb[2].mxu1 }
 0x244   : > { %v2377_v27 = vpack.c.bf16 %v784_v26, %v778_v22  ;;  %v786_v28 = vpop.f32.mrb[3].mxu0  ;;  %v2401_v29 = vpack.c.bf16 %v3668_v8, %v3664_v23  ;;  %v3672_v30 = vpop.f32.mrb[3].mxu1  ;;  %v520_v23 = vld [vmem:[%s3556_s25] sm:$0xff]  ;;  %v523_v8 = vld [vmem:[%s3556_s25 + $0x18] sm:$0xff] }
 0x245   : > { %v2329_v31 = vpack.c.bf16 %v786_v28, %v780_v24  ;;  %v2353_v32 = vpack.c.bf16 %v3672_v30, %v3666_v25  ;;  %v584_v25 = vld [vmem:[%s3563_s19] sm:$0xff]  ;;  %v522_v30 = vld [vmem:[%s3556_s25 + $0x10] sm:$0xff] }
 0x246   : > { %2378 = vmatpush1.bf16.msra.mxu0 %v2377_v27 }
 0x247   : > { %v790_v33 = vpop.f32.mrb[4].mxu0  ;;  %2330 = vmatpush1.bf16.msra.mxu1 %v2329_v31  ;;  %2379 = vmatprep.subr.bf16.mxu0 %v3058_v19  ;;  %v3677_v34 = vpop.f32.mrb[4].mxu1 }
 0x248   : > { %v792_v35 = vpop.f32.mrb[5].mxu0  ;;  %2331 = vmatprep.subr.bf16.mxu1 %v3058_v19  ;;  %v3680_v36 = vpop.f32.mrb[5].mxu1 }
 0x24b   : > { %v796_v37 = vpop.f32.mrb[6].mxu0  ;;  %v3682_v38 = vpop.f32.mrb[6].mxu1 }
 0x24c   : > { %v2380_v39 = vpack.c.bf16 %v796_v37, %v790_v33  ;;  %v798_v40 = vpop.f32.mrb[7].mxu0  ;;  %v2404_v41 = vpack.c.bf16 %v3682_v38, %v3677_v34  ;;  %v3686_v42 = vpop.f32.mrb[7].mxu1  ;;  %v525_v34 = vld [vmem:[%s3556_s25 + $0x28] sm:$0xff]  ;;  %v588_v38 = vld [vmem:[%s3563_s19 + $0x20] sm:$0xff] }
 0x24d   : > { %v2332_v43 = vpack.c.bf16 %v798_v40, %v792_v35  ;;  %v2356_v44 = vpack.c.bf16 %v3686_v42, %v3680_v36  ;;  %v524_v36 = vld [vmem:[%s3556_s25 + $0x20] sm:$0xff]  ;;  %v591_v42 = vld [vmem:[%s3563_s19 + $0x38] sm:$0xff] }
 0x24e   : > { %2381 = vmatpush1.bf16.msra.mxu0 %v2380_v39 }
 0x24f   : > { %v802_v45 = vpop.f32.mrb[8].mxu0  ;;  %2333 = vmatpush1.bf16.msra.mxu1 %v2332_v43  ;;  %2382 = vmatprep.subr.bf16.mxu0 %v3058_v19  ;;  %v3691_v46 = vpop.f32.mrb[8].mxu1 }
 0x250   : > { %v804_v47 = vpop.f32.mrb[9].mxu0  ;;  %2334 = vmatprep.subr.bf16.mxu1 %v3058_v19  ;;  %v3694_v48 = vpop.f32.mrb[9].mxu1 }
 0x253   : > { %v808_v49 = vpop.f32.mrb[10].mxu0  ;;  %v3696_v50 = vpop.f32.mrb[10].mxu1 }
 0x254   : > { %v2383_v51 = vpack.c.bf16 %v808_v49, %v802_v45  ;;  %v810_v52 = vpop.f32.mrb[11].mxu0  ;;  %v2407_v53 = vpack.c.bf16 %v3696_v50, %v3691_v46  ;;  %v3700_v54 = vpop.f32.mrb[11].mxu1  ;;  %v590_v46 = vld [vmem:[%s3563_s19 + $0x30] sm:$0xff]  ;;  %v593_v50 = vld [vmem:[%s3563_s19 + $0x48] sm:$0xff] }
 0x255   : > { %v2335_v55 = vpack.c.bf16 %v810_v52, %v804_v47  ;;  %v2359_v56 = vpack.c.bf16 %v3700_v54, %v3694_v48  ;;  %v529_v48 = vld [vmem:[%s3556_s25 + $0x48] sm:$0xff]  ;;  %v592_v54 = vld [vmem:[%s3563_s19 + $0x40] sm:$0xff] }
 0x256   : > { %2384 = vmatpush1.bf16.msra.mxu0 %v2383_v51 }
 0x257   : > { %v814_v57 = vpop.f32.mrb[12].mxu0  ;;  %2336 = vmatpush1.bf16.msra.mxu1 %v2335_v55  ;;  %2385 = vmatprep.subr.bf16.mxu0 %v3058_v19  ;;  %v3705_v58 = vpop.f32.mrb[12].mxu1 }
 0x258   : > { %v816_v59 = vpop.f32.mrb[13].mxu0  ;;  %2337 = vmatprep.subr.bf16.mxu1 %v3058_v19  ;;  %v3708_v60 = vpop.f32.mrb[13].mxu1 }
 0x25b   : > { %v820_v61 = vpop.f32.mrb[14].mxu0  ;;  %v3710_v62 = vpop.f32.mrb[14].mxu1 }
 0x25c   : > { %v2386_v63 = vpack.c.bf16 %v820_v61, %v814_v57  ;;  %v822_v0 = vpop.f32.mrb[15].mxu0  ;;  %v2410_v1 = vpack.c.bf16 %v3710_v62, %v3705_v58  ;;  %v3714_v2 = vpop.f32.mrb[15].mxu1  ;;  %v595_v58 = vld [vmem:[%s3563_s19 + $0x58] sm:$0xff]  ;;  %v594_v62 = vld [vmem:[%s3563_s19 + $0x50] sm:$0xff] }
 0x25d   : > { %v2338_v3 = vpack.c.bf16 %v822_v0, %v816_v59  ;;  %v2362_v4 = vpack.c.bf16 %v3714_v2, %v3708_v60  ;;  %v530_v60 = vld [vmem:[%s3556_s25 + $0x50] sm:$0xff]  ;;  %v597_v2 = vld [vmem:[%s3563_s19 + $0x68] sm:$0xff] }
 0x25e   : > { %2387 = vmatpush1.bf16.msra.mxu0 %v2386_v63 }
 0x25f   : > { %v826_v5 = vpop.f32.mrb[16].mxu0  ;;  %2339 = vmatpush1.bf16.msra.mxu1 %v2338_v3  ;;  %2388 = vmatprep.subr.bf16.mxu0 %v3058_v19  ;;  %v3719_v6 = vpop.f32.mrb[16].mxu1 }
 0x260   : > { %v828_v7 = vpop.f32.mrb[17].mxu0  ;;  %2340 = vmatprep.subr.bf16.mxu1 %v3058_v19  ;;  %v3722_v9 = vpop.f32.mrb[17].mxu1 }
 0x263   : > { %v832_v10 = vpop.f32.mrb[18].mxu0  ;;  %v3724_v11 = vpop.f32.mrb[18].mxu1 }
 0x264   : > { %v2389_v12 = vpack.c.bf16 %v832_v10, %v826_v5  ;;  %v834_v13 = vpop.f32.mrb[19].mxu0  ;;  %v2413_v14 = vpack.c.bf16 %v3724_v11, %v3719_v6  ;;  %v3728_v15 = vpop.f32.mrb[19].mxu1  ;;  %v596_v6 = vld [vmem:[%s3563_s19 + $0x60] sm:$0xff]  ;;  %v599_v11 = vld [vmem:[%s3563_s19 + $0x78] sm:$0xff] }
 0x265   : > { %v2341_v16 = vpack.c.bf16 %v834_v13, %v828_v7  ;;  %v2365_v17 = vpack.c.bf16 %v3728_v15, %v3722_v9  ;;  %v535_v9 = vld [vmem:[%s3556_s25 + $0x78] sm:$0xff]  ;;  %v598_v15 = vld [vmem:[%s3563_s19 + $0x70] sm:$0xff] }
 0x266   : > { %2390 = vmatpush1.bf16.msra.mxu0 %v2389_v12 }
 0x267   : > { %v838_v18 = vpop.f32.mrb[20].mxu0  ;;  %2342 = vmatpush1.bf16.msra.mxu1 %v2341_v16  ;;  %2391 = vmatprep.subr.bf16.mxu0 %v3058_v19  ;;  %v3733_v20 = vpop.f32.mrb[20].mxu1 }
 0x268   : > { %v840_v21 = vpop.f32.mrb[21].mxu0  ;;  %2343 = vmatprep.subr.bf16.mxu1 %v3058_v19  ;;  %v3736_v22 = vpop.f32.mrb[21].mxu1 }
 0x26b   : > { %v844_v24 = vpop.f32.mrb[22].mxu0  ;;  %v3738_v26 = vpop.f32.mrb[22].mxu1 }
 0x26c   : > { %v2392_v27 = vpack.c.bf16 %v844_v24, %v838_v18  ;;  %v846_v28 = vpop.f32.mrb[23].mxu0  ;;  %v2416_v31 = vpack.c.bf16 %v3738_v26, %v3733_v20  ;;  %v942_v33 = vpop.f32.mrb[23].mxu1  ;;  %v536_v24 = vld [vmem:[%s3556_s25 + $0x80] sm:$0xff] }
 0x26d   : > { %v2344_v35 = vpack.c.bf16 %v846_v28, %v840_v21  ;;  %v2368_v37 = vpack.c.bf16 %v942_v33, %v3736_v22  ;;  %v601_v22 = vld [vmem:[%s3563_s19 + $0x88] sm:$0xff]  ;;  %v600_v26 = vld [vmem:[%s3563_s19 + $0x80] sm:$0xff]  ;;  %v603_v28 = vld [vmem:[%s3563_s19 + $0x98] sm:$0xff] }
 0x26e   : > { %2393 = vmatpush1.bf16.msra.mxu0 %v2392_v27  ;;  %v539_v27 = vld [vmem:[%s3556_s25 + $0x98] sm:$0xff]  ;;  %v602_v33 = vld [vmem:[%s3563_s19 + $0x90] sm:$0xff] }
 0x26f   : > { %v850_v39 = vpop.f32.mrb[24].mxu0  ;;  %2345 = vmatpush1.bf16.msra.mxu1 %v2344_v35  ;;  %2394 = vmatprep.subr.bf16.mxu0 %v3058_v19  ;;  %v946_v40 = vpop.f32.mrb[24].mxu1  ;;  %v541_v35 = vld [vmem:[%s3556_s25 + $0xa8] sm:$0xff] }
 0x270   : > { %v852_v43 = vpop.f32.mrb[25].mxu0  ;;  %2346 = vmatprep.subr.bf16.mxu1 %v3058_v19  ;;  %v948_v45 = vpop.f32.mrb[25].mxu1 }
 0x273   : > { %v856_v47 = vpop.f32.mrb[26].mxu0  ;;  %v952_v49 = vpop.f32.mrb[26].mxu1 }
 0x274   : > { %v2395_v51 = vpack.c.bf16 %v856_v47, %v850_v39  ;;  %v858_v52 = vpop.f32.mrb[27].mxu0  ;;  %v2419_v55 = vpack.c.bf16 %v952_v49, %v946_v40  ;;  %v954_v57 = vpop.f32.mrb[27].mxu1  ;;  %v540_v39 = vld [vmem:[%s3556_s25 + $0xa0] sm:$0xff]  ;;  %v542_v47 = vld [vmem:[%s3556_s25 + $0xb0] sm:$0xff] }
 0x275   : > { %v2347_v59 = vpack.c.bf16 %v858_v52, %v852_v43  ;;  %v2371_v61 = vpack.c.bf16 %v954_v57, %v948_v45  ;;  %v604_v40 = vld [vmem:[%s3563_s19 + $0xa0] sm:$0xff]  ;;  %v543_v43 = vld [vmem:[%s3556_s25 + $0xb8] sm:$0xff]  ;;  %v606_v49 = vld [vmem:[%s3563_s19 + $0xb0] sm:$0xff] }
 0x276   : > { %2396 = vmatpush1.bf16.msra.mxu0 %v2395_v51  ;;  %v607_v45 = vld [vmem:[%s3563_s19 + $0xb8] sm:$0xff]  ;;  %v545_v51 = vld [vmem:[%s3556_s25 + $0xc8] sm:$0xff]  ;;  %v608_v57 = vld [vmem:[%s3563_s19 + $0xc0] sm:$0xff] }
 0x277   : > { %v862_v63 = vpop.f32.mrb[28].mxu0  ;;  %2348 = vmatpush1.bf16.msra.mxu1 %v2347_v59  ;;  %2397 = vmatprep.subr.bf16.mxu0 %v3058_v19  ;;  %v958_v0 = vpop.f32.mrb[28].mxu1  ;;  %v609_v52 = vld [vmem:[%s3563_s19 + $0xc8] sm:$0xff]  ;;  %v547_v59 = vld [vmem:[%s3556_s25 + $0xd8] sm:$0xff] }
 0x278   : > { %v864_v3 = vpop.f32.mrb[29].mxu0  ;;  %2349 = vmatprep.subr.bf16.mxu1 %v3058_v19  ;;  %v960_v5 = vpop.f32.mrb[29].mxu1 }
 0x27b   : > { %v868_v7 = vpop.f32.mrb[30].mxu0  ;;  %v964_v10 = vpop.f32.mrb[30].mxu1 }
 0x27c   : > { %v2398_v12 = vpack.c.bf16 %v868_v7, %v862_v63  ;;  %v870_v13 = vpop.f32.mrb[31].mxu0  ;;  %v2422_v16 = vpack.c.bf16 %v964_v10, %v958_v0  ;;  %v966_v18 = vpop.f32.mrb[31].mxu1  ;;  %v546_v63 = vld [vmem:[%s3556_s25 + $0xd0] sm:$0xff]  ;;  %v548_v7 = vld [vmem:[%s3556_s25 + $0xe0] sm:$0xff] }
 0x27d   : > { %v2350_v20 = vpack.c.bf16 %v870_v13, %v864_v3  ;;  %v2374_v21 = vpack.c.bf16 %v966_v18, %v960_v5  ;;  %v610_v0 = vld [vmem:[%s3563_s19 + $0xd0] sm:$0xff]  ;;  %v549_v3 = vld [vmem:[%s3556_s25 + $0xe8] sm:$0xff]  ;;  %v612_v10 = vld [vmem:[%s3563_s19 + $0xe0] sm:$0xff] }
 0x27e   : > { %2399 = vmatpush1.bf16.msra.mxu0 %v2398_v12  ;;  %v613_v5 = vld [vmem:[%s3563_s19 + $0xe8] sm:$0xff]  ;;  %v551_v12 = vld [vmem:[%s3556_s25 + $0xf8] sm:$0xff]  ;;  %v614_v18 = vld [vmem:[%s3563_s19 + $0xf0] sm:$0xff] }
 0x27f   : > { %2351 = vmatpush1.bf16.msra.mxu1 %v2350_v20  ;;  %2400 = vmatprep.subr.bf16.mxu0 %v3058_v19  ;;  %v615_v13 = vld [vmem:[%s3563_s19 + $0xf8] sm:$0xff]  ;;  %v553_v20 = vld [vmem:[%s3556_s25 + $0x108] sm:$0xff] }
 0x280   : > { %2352 = vmatprep.subr.bf16.mxu1 %v3058_v19 }
 0x282   : > { %2402 = vmatpush1.bf16.msra.mxu0 %v2401_v29  ;;  %v587_v29 = vld [vmem:[%s3563_s19 + $0x18] sm:$0xff] }
 0x283   : > { %2354 = vmatpush1.bf16.msra.mxu1 %v2353_v32  ;;  %2403 = vmatprep.subr.bf16.mxu0 %v3058_v19  ;;  %v586_v32 = vld [vmem:[%s3563_s19 + $0x10] sm:$0xff] }
 0x284   : > { %2355 = vmatprep.subr.bf16.mxu1 %v3058_v19 }
 0x286   : > { %2405 = vmatpush1.bf16.msra.mxu0 %v2404_v41  ;;  %v527_v41 = vld [vmem:[%s3556_s25 + $0x38] sm:$0xff] }
 0x287   : > { %2357 = vmatpush1.bf16.msra.mxu1 %v2356_v44  ;;  %2406 = vmatprep.subr.bf16.mxu0 %v3058_v19  ;;  %v526_v44 = vld [vmem:[%s3556_s25 + $0x30] sm:$0xff] }
 0x288   : > { %2358 = vmatprep.subr.bf16.mxu1 %v3058_v19 }
 0x28a   : > { %2408 = vmatpush1.bf16.msra.mxu0 %v2407_v53  ;;  %v528_v53 = vld [vmem:[%s3556_s25 + $0x40] sm:$0xff] }
 0x28b   : > { %2360 = vmatpush1.bf16.msra.mxu1 %v2359_v56  ;;  %2409 = vmatprep.subr.bf16.mxu0 %v3058_v19  ;;  %v531_v56 = vld [vmem:[%s3556_s25 + $0x58] sm:$0xff] }
 0x28c   : > { %2361 = vmatprep.subr.bf16.mxu1 %v3058_v19 }
 0x28e   : > { %2411 = vmatpush1.bf16.msra.mxu0 %v2410_v1  ;;  %v533_v1 = vld [vmem:[%s3556_s25 + $0x68] sm:$0xff] }
 0x28f   : > { %2363 = vmatpush1.bf16.msra.mxu1 %v2362_v4  ;;  %2412 = vmatprep.subr.bf16.mxu0 %v3058_v19  ;;  %v532_v4 = vld [vmem:[%s3556_s25 + $0x60] sm:$0xff] }
 0x290   : > { %2364 = vmatprep.subr.bf16.mxu1 %v3058_v19 }
 0x292   : > { %2414 = vmatpush1.bf16.msra.mxu0 %v2413_v14  ;;  %v534_v14 = vld [vmem:[%s3556_s25 + $0x70] sm:$0xff] }
 0x293   : > { %2366 = vmatpush1.bf16.msra.mxu1 %v2365_v17  ;;  %2415 = vmatprep.subr.bf16.mxu0 %v3058_v19  ;;  %v537_v17 = vld [vmem:[%s3556_s25 + $0x88] sm:$0xff] }
 0x294   : > { %2367 = vmatprep.subr.bf16.mxu1 %v3058_v19 }
 0x296   : > { %2417 = vmatpush1.bf16.msra.mxu0 %v2416_v31  ;;  %v538_v31 = vld [vmem:[%s3556_s25 + $0x90] sm:$0xff] }
 0x297   : > { %2369 = vmatpush1.bf16.msra.mxu1 %v2368_v37  ;;  %2418 = vmatprep.subr.bf16.mxu0 %v3058_v19  ;;  %v605_v37 = vld [vmem:[%s3563_s19 + $0xa8] sm:$0xff] }
 0x298   : > { %2370 = vmatprep.subr.bf16.mxu1 %v3058_v19 }
 0x29a   : > { %2420 = vmatpush1.bf16.msra.mxu0 %v2419_v55  ;;  %v544_v55 = vld [vmem:[%s3556_s25 + $0xc0] sm:$0xff] }
 0x29b   : > { %2372 = vmatpush1.bf16.msra.mxu1 %v2371_v61  ;;  %2421 = vmatprep.subr.bf16.mxu0 %v3058_v19  ;;  %v611_v61 = vld [vmem:[%s3563_s19 + $0xd8] sm:$0xff] }
 0x29c   : > { %2373 = vmatprep.subr.bf16.mxu1 %v3058_v19  ;;  %v589_v19 = vld [vmem:[%s3563_s19 + $0x28] sm:$0xff] }
 0x29e   : > { %2423 = vmatpush1.bf16.msra.mxu0 %v2422_v16  ;;  %v550_v16 = vld [vmem:[%s3556_s25 + $0xf0] sm:$0xff] }
 0x29f   : > { %2375 = vmatpush1.bf16.msra.mxu1 %v2374_v21  ;;  %v617_v21 = vld [vmem:[%s3563_s19 + $0x108] sm:$0xff] }
 0x2a1   : > { %1291 = vmatmul.mubr.f32.vlgmr.msra.gmra.mrb[32].mxu0 %v520_v23  ;;  %v552_v23 = vld [vmem:[%s3556_s25 + $0x100] sm:$0xff] }
 0x2a2   : > { %1066 = vmatmul.mubr.f32.vlgmr.msra.gmra.mrb[32].mxu1 %v584_v25  ;;  %1295 = vmatprep.mubr.f32.mxu0 %v523_v8  ;;  %v616_v25 = vld [vmem:[%s3563_s19 + $0x100] sm:$0xff]  ;;  %v555_v8 = vld [vmem:[%s3556_s25 + $0x118] sm:$0xff] }
 0x2a3   : > { %1070 = vmatprep.mubr.f32.mxu1 %v587_v29  ;;  %v619_v29 = vld [vmem:[%s3563_s19 + $0x118] sm:$0xff] }
 0x2a5   : > { %1296 = vmatmul.mubr.f32.gmra.mrb[34].mxu0 %v522_v30  ;;  %v554_v30 = vld [vmem:[%s3556_s25 + $0x110] sm:$0xff] }
 0x2a6   : > { %1071 = vmatmul.mubr.f32.gmra.mrb[34].mxu1 %v586_v32  ;;  %1300 = vmatprep.mubr.f32.mxu0 %v525_v34  ;;  %v618_v32 = vld [vmem:[%s3563_s19 + $0x110] sm:$0xff]  ;;  %v557_v34 = vld [vmem:[%s3556_s25 + $0x128] sm:$0xff] }
 0x2a7   : > { %1075 = vmatprep.mubr.f32.mxu1 %v589_v19  ;;  %v621_v19 = vld [vmem:[%s3563_s19 + $0x128] sm:$0xff] }
 0x2a9   : > { %1301 = vmatmul.mubr.f32.gmra.mrb[36].mxu0 %v524_v36  ;;  %v556_v36 = vld [vmem:[%s3556_s25 + $0x120] sm:$0xff] }
 0x2aa   : > { %1076 = vmatmul.mubr.f32.gmra.mrb[36].mxu1 %v588_v38  ;;  %1305 = vmatprep.mubr.f32.mxu0 %v527_v41  ;;  %v620_v38 = vld [vmem:[%s3563_s19 + $0x120] sm:$0xff]  ;;  %v559_v41 = vld [vmem:[%s3556_s25 + $0x138] sm:$0xff] }
 0x2ab   : > { %1080 = vmatprep.mubr.f32.mxu1 %v591_v42  ;;  %v623_v42 = vld [vmem:[%s3563_s19 + $0x138] sm:$0xff] }
 0x2ad   : > { %1306 = vmatmul.mubr.f32.gmra.mrb[38].mxu0 %v526_v44  ;;  %v558_v44 = vld [vmem:[%s3556_s25 + $0x130] sm:$0xff] }
 0x2ae   : > { %1081 = vmatmul.mubr.f32.gmra.mrb[38].mxu1 %v590_v46  ;;  %1310 = vmatprep.mubr.f32.mxu0 %v529_v48  ;;  %v622_v46 = vld [vmem:[%s3563_s19 + $0x130] sm:$0xff]  ;;  %v561_v48 = vld [vmem:[%s3556_s25 + $0x148] sm:$0xff] }
 0x2af   : > { %1085 = vmatprep.mubr.f32.mxu1 %v593_v50  ;;  %v625_v50 = vld [vmem:[%s3563_s19 + $0x148] sm:$0xff] }
 0x2b1   : > { %1311 = vmatmul.mubr.f32.gmra.mrb[40].mxu0 %v528_v53  ;;  %v560_v53 = vld [vmem:[%s3556_s25 + $0x140] sm:$0xff] }
 0x2b2   : > { %1086 = vmatmul.mubr.f32.gmra.mrb[40].mxu1 %v592_v54  ;;  %1315 = vmatprep.mubr.f32.mxu0 %v531_v56  ;;  %v624_v54 = vld [vmem:[%s3563_s19 + $0x140] sm:$0xff]  ;;  %v563_v56 = vld [vmem:[%s3556_s25 + $0x158] sm:$0xff] }
 0x2b3   : > { %1090 = vmatprep.mubr.f32.mxu1 %v595_v58  ;;  %v627_v58 = vld [vmem:[%s3563_s19 + $0x158] sm:$0xff] }
 0x2b5   : > { %1316 = vmatmul.mubr.f32.gmra.mrb[42].mxu0 %v530_v60  ;;  %v562_v60 = vld [vmem:[%s3556_s25 + $0x150] sm:$0xff] }
 0x2b6   : > { %1091 = vmatmul.mubr.f32.gmra.mrb[42].mxu1 %v594_v62  ;;  %1320 = vmatprep.mubr.f32.mxu0 %v533_v1  ;;  %v626_v62 = vld [vmem:[%s3563_s19 + $0x150] sm:$0xff]  ;;  %v565_v1 = vld [vmem:[%s3556_s25 + $0x168] sm:$0xff] }
 0x2b7   : > { %1095 = vmatprep.mubr.f32.mxu1 %v597_v2  ;;  %v629_v2 = vld [vmem:[%s3563_s19 + $0x168] sm:$0xff] }
 0x2b9   : > { %1321 = vmatmul.mubr.f32.gmra.mrb[44].mxu0 %v532_v4  ;;  %v564_v4 = vld [vmem:[%s3556_s25 + $0x160] sm:$0xff] }
 0x2ba   : > { %1096 = vmatmul.mubr.f32.gmra.mrb[44].mxu1 %v596_v6  ;;  %1325 = vmatprep.mubr.f32.mxu0 %v535_v9  ;;  %v628_v6 = vld [vmem:[%s3563_s19 + $0x160] sm:$0xff]  ;;  %v567_v9 = vld [vmem:[%s3556_s25 + $0x178] sm:$0xff] }
 0x2bb   : > { %1100 = vmatprep.mubr.f32.mxu1 %v599_v11  ;;  %v631_v11 = vld [vmem:[%s3563_s19 + $0x178] sm:$0xff] }
 0x2bd   : > { %1326 = vmatmul.mubr.f32.gmra.mrb[46].mxu0 %v534_v14  ;;  %v566_v14 = vld [vmem:[%s3556_s25 + $0x170] sm:$0xff] }
 0x2be   : > { %1101 = vmatmul.mubr.f32.gmra.mrb[46].mxu1 %v598_v15  ;;  %1330 = vmatprep.mubr.f32.mxu0 %v537_v17  ;;  %v630_v15 = vld [vmem:[%s3563_s19 + $0x170] sm:$0xff]  ;;  %v569_v17 = vld [vmem:[%s3556_s25 + $0x188] sm:$0xff] }
 0x2bf   : > { %1105 = vmatprep.mubr.f32.mxu1 %v601_v22  ;;  %v633_v22 = vld [vmem:[%s3563_s19 + $0x188] sm:$0xff] }
 0x2c1   : > { %1331 = vmatmul.mubr.f32.gmra.mrb[48].mxu0 %v536_v24  ;;  %v568_v24 = vld [vmem:[%s3556_s25 + $0x180] sm:$0xff] }
 0x2c2   : > { %1106 = vmatmul.mubr.f32.gmra.mrb[48].mxu1 %v600_v26  ;;  %1335 = vmatprep.mubr.f32.mxu0 %v539_v27  ;;  %v632_v26 = vld [vmem:[%s3563_s19 + $0x180] sm:$0xff]  ;;  %v571_v27 = vld [vmem:[%s3556_s25 + $0x198] sm:$0xff] }
 0x2c3   : > { %1110 = vmatprep.mubr.f32.mxu1 %v603_v28  ;;  %v635_v28 = vld [vmem:[%s3563_s19 + $0x198] sm:$0xff] }
 0x2c5   : > { %1336 = vmatmul.mubr.f32.gmra.mrb[50].mxu0 %v538_v31  ;;  %v570_v31 = vld [vmem:[%s3556_s25 + $0x190] sm:$0xff] }
 0x2c6   : > { %1111 = vmatmul.mubr.f32.gmra.mrb[50].mxu1 %v602_v33  ;;  %1340 = vmatprep.mubr.f32.mxu0 %v541_v35  ;;  %v634_v33 = vld [vmem:[%s3563_s19 + $0x190] sm:$0xff]  ;;  %v573_v35 = vld [vmem:[%s3556_s25 + $0x1a8] sm:$0xff] }
 0x2c7   : > { %1115 = vmatprep.mubr.f32.mxu1 %v605_v37  ;;  %v637_v37 = vld [vmem:[%s3563_s19 + $0x1a8] sm:$0xff] }
 0x2c9   : > { %1341 = vmatmul.mubr.f32.gmra.mrb[52].mxu0 %v540_v39  ;;  %v572_v39 = vld [vmem:[%s3556_s25 + $0x1a0] sm:$0xff] }
 0x2ca   : > { %1116 = vmatmul.mubr.f32.gmra.mrb[52].mxu1 %v604_v40  ;;  %1345 = vmatprep.mubr.f32.mxu0 %v543_v43  ;;  %v636_v40 = vld [vmem:[%s3563_s19 + $0x1a0] sm:$0xff]  ;;  %v575_v43 = vld [vmem:[%s3556_s25 + $0x1b8] sm:$0xff] }
 0x2cb   : > { %1120 = vmatprep.mubr.f32.mxu1 %v607_v45  ;;  %v639_v45 = vld [vmem:[%s3563_s19 + $0x1b8] sm:$0xff] }
 0x2cd   : > { %1346 = vmatmul.mubr.f32.gmra.mrb[54].mxu0 %v542_v47  ;;  %v574_v47 = vld [vmem:[%s3556_s25 + $0x1b0] sm:$0xff] }
 0x2ce   : > { %1121 = vmatmul.mubr.f32.gmra.mrb[54].mxu1 %v606_v49  ;;  %1350 = vmatprep.mubr.f32.mxu0 %v545_v51  ;;  %v638_v49 = vld [vmem:[%s3563_s19 + $0x1b0] sm:$0xff]  ;;  %v577_v51 = vld [vmem:[%s3556_s25 + $0x1c8] sm:$0xff] }
 0x2cf   : > { %1125 = vmatprep.mubr.f32.mxu1 %v609_v52  ;;  %v641_v52 = vld [vmem:[%s3563_s19 + $0x1c8] sm:$0xff] }
 0x2d1   : > { %1351 = vmatmul.mubr.f32.gmra.mrb[56].mxu0 %v544_v55  ;;  %v576_v55 = vld [vmem:[%s3556_s25 + $0x1c0] sm:$0xff] }
 0x2d2   : > { %1126 = vmatmul.mubr.f32.gmra.mrb[56].mxu1 %v608_v57  ;;  %1355 = vmatprep.mubr.f32.mxu0 %v547_v59  ;;  %v640_v57 = vld [vmem:[%s3563_s19 + $0x1c0] sm:$0xff]  ;;  %v579_v59 = vld [vmem:[%s3556_s25 + $0x1d8] sm:$0xff] }
 0x2d3   : > { %1130 = vmatprep.mubr.f32.mxu1 %v611_v61  ;;  %v643_v61 = vld [vmem:[%s3563_s19 + $0x1d8] sm:$0xff] }
 0x2d5   : > { %1356 = vmatmul.mubr.f32.gmra.mrb[58].mxu0 %v546_v63  ;;  %v578_v63 = vld [vmem:[%s3556_s25 + $0x1d0] sm:$0xff] }
 0x2d6   : > { %1131 = vmatmul.mubr.f32.gmra.mrb[58].mxu1 %v610_v0  ;;  %1360 = vmatprep.mubr.f32.mxu0 %v549_v3  ;;  %v642_v0 = vld [vmem:[%s3563_s19 + $0x1d0] sm:$0xff]  ;;  %v581_v3 = vld [vmem:[%s3556_s25 + $0x1e8] sm:$0xff] }
 0x2d7   : > { %1135 = vmatprep.mubr.f32.mxu1 %v613_v5  ;;  %v645_v5 = vld [vmem:[%s3563_s19 + $0x1e8] sm:$0xff] }
 0x2d9   : > { %1361 = vmatmul.mubr.f32.gmra.mrb[60].mxu0 %v548_v7  ;;  %v580_v7 = vld [vmem:[%s3556_s25 + $0x1e0] sm:$0xff] }
 0x2da   : > { %1136 = vmatmul.mubr.f32.gmra.mrb[60].mxu1 %v612_v10  ;;  %1365 = vmatprep.mubr.f32.mxu0 %v551_v12  ;;  %v644_v10 = vld [vmem:[%s3563_s19 + $0x1e0] sm:$0xff]  ;;  %v583_v12 = vld [vmem:[%s3556_s25 + $0x1f8] sm:$0xff] }
 0x2db   : > { %1140 = vmatprep.mubr.f32.mxu1 %v615_v13  ;;  %v647_v13 = vld [vmem:[%s3563_s19 + $0x1f8] sm:$0xff] }
 0x2dd   : > { %1366 = vmatmul.mubr.f32.gmra.mrb[62].mxu0 %v550_v16  ;;  %v582_v16 = vld [vmem:[%s3556_s25 + $0x1f0] sm:$0xff] }
 0x2de   : > { %1141 = vmatmul.mubr.f32.gmra.mrb[62].mxu1 %v614_v18  ;;  %1370 = vmatprep.mubr.f32.mxu0 %v553_v20  ;;  %v646_v18 = vld [vmem:[%s3563_s19 + $0x1f0] sm:$0xff] }
 0x2df   : > { %1145 = vmatprep.mubr.f32.mxu1 %v617_v21 }
 0x2e1   : > { %1371 = vmatmul.mubr.f32.gmra.mrb[64].mxu0 %v552_v23  ;;  %v969_v23 = vld [vmem:[#allocation2] sm:$0xff] }
 0x2e2   : > { %1146 = vmatmul.mubr.f32.gmra.mrb[64].mxu1 %v616_v25  ;;  %1375 = vmatprep.mubr.f32.mxu0 %v555_v8 }
 0x2e3   : > { %1150 = vmatprep.mubr.f32.mxu1 %v619_v29 }
 0x2e5   : > { %1376 = vmatmul.mubr.f32.gmra.mrb[66].mxu0 %v554_v30 }
 0x2e6   : > { %1151 = vmatmul.mubr.f32.gmra.mrb[66].mxu1 %v618_v32  ;;  %1380 = vmatprep.mubr.f32.mxu0 %v557_v34 }
 0x2e7   : > { %1155 = vmatprep.mubr.f32.mxu1 %v621_v19  ;;  %v970_v19 = vld [vmem:[#allocation2 + $0x8] sm:$0xff] }
 0x2e9   : > { %1381 = vmatmul.mubr.f32.gmra.mrb[68].mxu0 %v556_v36 }
 0x2ea   : > { %1156 = vmatmul.mubr.f32.gmra.mrb[68].mxu1 %v620_v38  ;;  %1385 = vmatprep.mubr.f32.mxu0 %v559_v41 }
 0x2eb   : > { %1160 = vmatprep.mubr.f32.mxu1 %v623_v42 }
 0x2ed   : > { %1386 = vmatmul.mubr.f32.gmra.mrb[70].mxu0 %v558_v44 }
 0x2ee   : > { %1161 = vmatmul.mubr.f32.gmra.mrb[70].mxu1 %v622_v46  ;;  %1390 = vmatprep.mubr.f32.mxu0 %v561_v48  ;;  %v971_v48 = vld [vmem:[#allocation2 + $0x10] sm:$0xff] }
 0x2ef   : > { %1165 = vmatprep.mubr.f32.mxu1 %v625_v50 }
 0x2f1   : > { %1391 = vmatmul.mubr.f32.gmra.mrb[72].mxu0 %v560_v53 }
 0x2f2   : > { %1166 = vmatmul.mubr.f32.gmra.mrb[72].mxu1 %v624_v54  ;;  %1395 = vmatprep.mubr.f32.mxu0 %v563_v56 }
 0x2f3   : > { %1170 = vmatprep.mubr.f32.mxu1 %v627_v58 }
 0x2f5   : > { %1396 = vmatmul.mubr.f32.gmra.mrb[74].mxu0 %v562_v60 }
 0x2f6   : > { %1171 = vmatmul.mubr.f32.gmra.mrb[74].mxu1 %v626_v62  ;;  %1400 = vmatprep.mubr.f32.mxu0 %v565_v1  ;;  %v972_v62 = vld [vmem:[#allocation2 + $0x18] sm:$0xff] }
 0x2f7   : > { %1175 = vmatprep.mubr.f32.mxu1 %v629_v2 }
 0x2f9   : > { %1401 = vmatmul.mubr.f32.gmra.mrb[76].mxu0 %v564_v4 }
 0x2fa   : > { %1176 = vmatmul.mubr.f32.gmra.mrb[76].mxu1 %v628_v6  ;;  %1405 = vmatprep.mubr.f32.mxu0 %v567_v9 }
 0x2fb   : > { %1180 = vmatprep.mubr.f32.mxu1 %v631_v11 }
 0x2fd   : > { %1406 = vmatmul.mubr.f32.gmra.mrb[78].mxu0 %v566_v14  ;;  %v973_v14 = vld [vmem:[#allocation2 + $0x20] sm:$0xff] }
 0x2fe   : > { %1181 = vmatmul.mubr.f32.gmra.mrb[78].mxu1 %v630_v15  ;;  %1410 = vmatprep.mubr.f32.mxu0 %v569_v17 }
 0x2ff   : > { %1185 = vmatprep.mubr.f32.mxu1 %v633_v22 }
 0x301   : > { %1411 = vmatmul.mubr.f32.gmra.mrb[80].mxu0 %v568_v24 }
 0x302   : > { %1186 = vmatmul.mubr.f32.gmra.mrb[80].mxu1 %v632_v26  ;;  %1415 = vmatprep.mubr.f32.mxu0 %v571_v27 }
 0x303   : > { %1190 = vmatprep.mubr.f32.mxu1 %v635_v28  ;;  %v974_v28 = vld [vmem:[#allocation2 + $0x28] sm:$0xff] }
 0x305   : > { %1416 = vmatmul.mubr.f32.gmra.mrb[82].mxu0 %v570_v31 }
 0x306   : > { %1191 = vmatmul.mubr.f32.gmra.mrb[82].mxu1 %v634_v33  ;;  %1420 = vmatprep.mubr.f32.mxu0 %v573_v35 }
 0x307   : > { %1195 = vmatprep.mubr.f32.mxu1 %v637_v37 }
 0x309   : > { %1421 = vmatmul.mubr.f32.gmra.mrb[84].mxu0 %v572_v39 }
 0x30a   : > { %1196 = vmatmul.mubr.f32.gmra.mrb[84].mxu1 %v636_v40  ;;  %1425 = vmatprep.mubr.f32.mxu0 %v575_v43  ;;  %v975_v43 = vld [vmem:[#allocation2 + $0x30] sm:$0xff] }
 0x30b   : > { %1200 = vmatprep.mubr.f32.mxu1 %v639_v45 }
 0x30d   : > { %1426 = vmatmul.mubr.f32.gmra.mrb[86].mxu0 %v574_v47 }
 0x30e   : > { %1201 = vmatmul.mubr.f32.gmra.mrb[86].mxu1 %v638_v49  ;;  %1430 = vmatprep.mubr.f32.mxu0 %v577_v51 }
 0x30f   : > { %1205 = vmatprep.mubr.f32.mxu1 %v641_v52 }
 0x311   : > { %1431 = vmatmul.mubr.f32.gmra.mrb[88].mxu0 %v576_v55 }
 0x312   : > { %1206 = vmatmul.mubr.f32.gmra.mrb[88].mxu1 %v640_v57  ;;  %1435 = vmatprep.mubr.f32.mxu0 %v579_v59  ;;  %v976_v57 = vld [vmem:[#allocation2 + $0x38] sm:$0xff] }
 0x313   : > { %1210 = vmatprep.mubr.f32.mxu1 %v643_v61 }
 0x315   : > { %1436 = vmatmul.mubr.f32.gmra.mrb[90].mxu0 %v578_v63 }
 0x316   : > { %1211 = vmatmul.mubr.f32.gmra.mrb[90].mxu1 %v642_v0  ;;  %1440 = vmatprep.mubr.f32.mxu0 %v581_v3 }
 0x317   : > { %1215 = vmatprep.mubr.f32.mxu1 %v645_v5 }
 0x319   : > { %1441 = vmatmul.mubr.f32.gmra.mrb[92].mxu0 %v580_v7  ;;  %v977_v7 = vld [vmem:[#allocation2 + $0x40] sm:$0xff] }
 0x31a   : > { %1216 = vmatmul.mubr.f32.gmra.mrb[92].mxu1 %v644_v10  ;;  %1445 = vmatprep.mubr.f32.mxu0 %v583_v12 }
 0x31b   : > { %1220 = vmatprep.mubr.f32.mxu1 %v647_v13 }
 0x31d   : > { %1446 = vmatmul.mubr.f32.gmra.mrb[94].mxu0 %v582_v16 }
 0x31e   : > { %1221 = vmatmul.mubr.f32.gmra.mrb[94].mxu1 %v646_v18 }
 0x374   : > { %v1292_v20 = vpop.f32.mrb[32].mxu0 }
 0x375   : > { %v1067_v21 = vpop.f32.mrb[32].mxu1  ;;  %v1294_v25 = vpop.f32.mrb[33].mxu0 }
 0x376   : > { %v1293_v8 = vadd.f32 %v1292_v20, %v1067_v21  ;;  %v1069_v29 = vpop.f32.mrb[33].mxu1  ;;  %v978_v21 = vld [vmem:[#allocation2 + $0x48] sm:$0xff] }
 0x378   : > { %v1451_v30 = vadd.f32 %v1293_v8, %v969_v23  ;;  %v1297_v32 = vpop.f32.mrb[34].mxu0 }
 0x379   : > { %v1072_v34 = vpop.f32.mrb[34].mxu1  ;;  %v1299_v36 = vpop.f32.mrb[35].mxu0 }
 0x37a   : > { %1483 = vst [vmem:[#allocation2] sm:$0xff] %v1451_v30  ;;  %v1298_v38 = vadd.f32 %v1297_v32, %v1072_v34  ;;  %v1074_v41 = vpop.f32.mrb[35].mxu1  ;;  %v979_v34 = vld [vmem:[#allocation2 + $0x50] sm:$0xff] }
 0x37c   : > { %v1452_v42 = vadd.f32 %v1298_v38, %v970_v19  ;;  %v1302_v44 = vpop.f32.mrb[36].mxu0 }
 0x37d   : > { %v1077_v46 = vpop.f32.mrb[36].mxu1  ;;  %v1304_v50 = vpop.f32.mrb[37].mxu0 }
 0x37e   : > { %1484 = vst [vmem:[#allocation2 + $0x8] sm:$0xff] %v1452_v42  ;;  %v1303_v53 = vadd.f32 %v1302_v44, %v1077_v46  ;;  %v1079_v54 = vpop.f32.mrb[37].mxu1  ;;  %v980_v46 = vld [vmem:[#allocation2 + $0x58] sm:$0xff] }
 0x380   : > { %v1453_v56 = vadd.f32 %v1303_v53, %v971_v48  ;;  %v1307_v58 = vpop.f32.mrb[38].mxu0 }
 0x381   : > { %v1082_v60 = vpop.f32.mrb[38].mxu1  ;;  %v1309_v1 = vpop.f32.mrb[39].mxu0 }
 0x382   : > { %1485 = vst [vmem:[#allocation2 + $0x10] sm:$0xff] %v1453_v56  ;;  %v1308_v2 = vadd.f32 %v1307_v58, %v1082_v60  ;;  %v1084_v4 = vpop.f32.mrb[39].mxu1  ;;  %v981_v60 = vld [vmem:[#allocation2 + $0x60] sm:$0xff] }
 0x384   : > { %v1454_v6 = vadd.f32 %v1308_v2, %v972_v62  ;;  %v1312_v9 = vpop.f32.mrb[40].mxu0 }
 0x385   : > { %v1087_v11 = vpop.f32.mrb[40].mxu1  ;;  %v1314_v15 = vpop.f32.mrb[41].mxu0 }
 0x386   : > { %1486 = vst [vmem:[#allocation2 + $0x18] sm:$0xff] %v1454_v6  ;;  %v1313_v17 = vadd.f32 %v1312_v9, %v1087_v11  ;;  %v1089_v22 = vpop.f32.mrb[41].mxu1  ;;  %v982_v11 = vld [vmem:[#allocation2 + $0x68] sm:$0xff] }
 0x388   : > { %v1455_v24 = vadd.f32 %v1313_v17, %v973_v14  ;;  %v1317_v26 = vpop.f32.mrb[42].mxu0 }
 0x389   : > { %v1092_v27 = vpop.f32.mrb[42].mxu1  ;;  %v1319_v31 = vpop.f32.mrb[43].mxu0 }
 0x38a   : > { %1487 = vst [vmem:[#allocation2 + $0x20] sm:$0xff] %v1455_v24  ;;  %v1318_v33 = vadd.f32 %v1317_v26, %v1092_v27  ;;  %v1094_v35 = vpop.f32.mrb[43].mxu1  ;;  %v983_v27 = vld [vmem:[#allocation2 + $0x70] sm:$0xff] }
 0x38c   : > { %v1456_v37 = vadd.f32 %v1318_v33, %v974_v28  ;;  %v1322_v39 = vpop.f32.mrb[44].mxu0 }
 0x38d   : > { %v1097_v40 = vpop.f32.mrb[44].mxu1  ;;  %v1324_v45 = vpop.f32.mrb[45].mxu0 }
 0x38e   : > { %1488 = vst [vmem:[#allocation2 + $0x28] sm:$0xff] %v1456_v37  ;;  %v1323_v47 = vadd.f32 %v1322_v39, %v1097_v40  ;;  %v1099_v49 = vpop.f32.mrb[45].mxu1  ;;  %v984_v40 = vld [vmem:[#allocation2 + $0x78] sm:$0xff] }
 0x390   : > { %v1457_v51 = vadd.f32 %v1323_v47, %v975_v43  ;;  %v1327_v52 = vpop.f32.mrb[46].mxu0 }
 0x391   : > { %v1102_v55 = vpop.f32.mrb[46].mxu1  ;;  %v1329_v59 = vpop.f32.mrb[47].mxu0 }
 0x392   : > { %1489 = vst [vmem:[#allocation2 + $0x30] sm:$0xff] %v1457_v51  ;;  %v1328_v61 = vadd.f32 %v1327_v52, %v1102_v55  ;;  %v1104_v63 = vpop.f32.mrb[47].mxu1  ;;  %v985_v55 = vld [vmem:[#allocation2 + $0x80] sm:$0xff] }
 0x394   : > { %v1458_v0 = vadd.f32 %v1328_v61, %v976_v57  ;;  %v1332_v3 = vpop.f32.mrb[48].mxu0 }
 0x395   : > { %v1107_v5 = vpop.f32.mrb[48].mxu1  ;;  %v1334_v10 = vpop.f32.mrb[49].mxu0 }
 0x396   : > { %1490 = vst [vmem:[#allocation2 + $0x38] sm:$0xff] %v1458_v0  ;;  %v1333_v12 = vadd.f32 %v1332_v3, %v1107_v5  ;;  %v1109_v13 = vpop.f32.mrb[49].mxu1  ;;  %v986_v5 = vld [vmem:[#allocation2 + $0x88] sm:$0xff] }
 0x398   : > { %v1459_v16 = vadd.f32 %v1333_v12, %v977_v7  ;;  %v1337_v18 = vpop.f32.mrb[50].mxu0 }
 0x399   : > { %v1112_v20 = vpop.f32.mrb[50].mxu1  ;;  %v1339_v23 = vpop.f32.mrb[51].mxu0 }
 0x39a   : > { %1491 = vst [vmem:[#allocation2 + $0x40] sm:$0xff] %v1459_v16  ;;  %v1338_v25 = vadd.f32 %v1337_v18, %v1112_v20  ;;  %v1114_v8 = vpop.f32.mrb[51].mxu1  ;;  %v987_v20 = vld [vmem:[#allocation2 + $0x90] sm:$0xff] }
 0x39c   : > { %v1460_v29 = vadd.f32 %v1338_v25, %v978_v21  ;;  %v1342_v30 = vpop.f32.mrb[52].mxu0 }
 0x39d   : > { %v1117_v32 = vpop.f32.mrb[52].mxu1  ;;  %v1344_v19 = vpop.f32.mrb[53].mxu0 }
 0x39e   : > { %1492 = vst [vmem:[#allocation2 + $0x48] sm:$0xff] %v1460_v29  ;;  %v1343_v36 = vadd.f32 %v1342_v30, %v1117_v32  ;;  %v1119_v38 = vpop.f32.mrb[53].mxu1  ;;  %v988_v32 = vld [vmem:[#allocation2 + $0x98] sm:$0xff] }
 0x3a0   : > { %v1461_v41 = vadd.f32 %v1343_v36, %v979_v34  ;;  %v1347_v42 = vpop.f32.mrb[54].mxu0 }
 0x3a1   : > { %v1122_v44 = vpop.f32.mrb[54].mxu1  ;;  %v1349_v48 = vpop.f32.mrb[55].mxu0 }
 0x3a2   : > { %1493 = vst [vmem:[#allocation2 + $0x50] sm:$0xff] %v1461_v41  ;;  %v1348_v50 = vadd.f32 %v1347_v42, %v1122_v44  ;;  %v1124_v53 = vpop.f32.mrb[55].mxu1  ;;  %v989_v44 = vld [vmem:[#allocation2 + $0xa0] sm:$0xff] }
 0x3a4   : > { %v1462_v54 = vadd.f32 %v1348_v50, %v980_v46  ;;  %v1352_v56 = vpop.f32.mrb[56].mxu0 }
 0x3a5   : > { %v1127_v58 = vpop.f32.mrb[56].mxu1  ;;  %v1354_v62 = vpop.f32.mrb[57].mxu0 }
 0x3a6   : > { %1494 = vst [vmem:[#allocation2 + $0x58] sm:$0xff] %v1462_v54  ;;  %v1353_v1 = vadd.f32 %v1352_v56, %v1127_v58  ;;  %v1129_v2 = vpop.f32.mrb[57].mxu1  ;;  %v990_v58 = vld [vmem:[#allocation2 + $0xa8] sm:$0xff] }
 0x3a8   : > { %v1463_v4 = vadd.f32 %v1353_v1, %v981_v60  ;;  %v1357_v6 = vpop.f32.mrb[58].mxu0 }
 0x3a9   : > { %v1132_v9 = vpop.f32.mrb[58].mxu1  ;;  %v1359_v14 = vpop.f32.mrb[59].mxu0 }
 0x3aa   : > { %1495 = vst [vmem:[#allocation2 + $0x60] sm:$0xff] %v1463_v4  ;;  %v1358_v15 = vadd.f32 %v1357_v6, %v1132_v9  ;;  %v1134_v17 = vpop.f32.mrb[59].mxu1  ;;  %v991_v9 = vld [vmem:[#allocation2 + $0xb0] sm:$0xff] }
 0x3ac   : > { %v1464_v22 = vadd.f32 %v1358_v15, %v982_v11  ;;  %v1362_v24 = vpop.f32.mrb[60].mxu0 }
 0x3ad   : > { %v1137_v26 = vpop.f32.mrb[60].mxu1  ;;  %v1364_v28 = vpop.f32.mrb[61].mxu0 }
 0x3ae   : > { %1496 = vst [vmem:[#allocation2 + $0x68] sm:$0xff] %v1464_v22  ;;  %v1363_v31 = vadd.f32 %v1362_v24, %v1137_v26  ;;  %v1139_v33 = vpop.f32.mrb[61].mxu1  ;;  %v992_v26 = vld [vmem:[#allocation2 + $0xb8] sm:$0xff] }
 0x3b0   : > { %v1465_v35 = vadd.f32 %v1363_v31, %v983_v27  ;;  %v1367_v37 = vpop.f32.mrb[62].mxu0 }
 0x3b1   : > { %v1142_v39 = vpop.f32.mrb[62].mxu1  ;;  %v1369_v43 = vpop.f32.mrb[63].mxu0 }
 0x3b2   : > { %1497 = vst [vmem:[#allocation2 + $0x70] sm:$0xff] %v1465_v35  ;;  %v1368_v45 = vadd.f32 %v1367_v37, %v1142_v39  ;;  %v1144_v47 = vpop.f32.mrb[63].mxu1  ;;  %v993_v39 = vld [vmem:[#allocation2 + $0xc0] sm:$0xff] }
 0x3b4   : > { %v1466_v49 = vadd.f32 %v1368_v45, %v984_v40  ;;  %v1372_v51 = vpop.f32.mrb[64].mxu0 }
 0x3b5   : > { %v1147_v52 = vpop.f32.mrb[64].mxu1  ;;  %v1374_v57 = vpop.f32.mrb[65].mxu0 }
 0x3b6   : > { %1498 = vst [vmem:[#allocation2 + $0x78] sm:$0xff] %v1466_v49  ;;  %v1373_v59 = vadd.f32 %v1372_v51, %v1147_v52  ;;  %v1149_v61 = vpop.f32.mrb[65].mxu1  ;;  %v994_v52 = vld [vmem:[#allocation2 + $0xc8] sm:$0xff] }
 0x3b8   : > { %v1467_v63 = vadd.f32 %v1373_v59, %v985_v55  ;;  %v1377_v0 = vpop.f32.mrb[66].mxu0 }
 0x3b9   : > { %v1152_v3 = vpop.f32.mrb[66].mxu1  ;;  %v1379_v7 = vpop.f32.mrb[67].mxu0 }
 0x3ba   : > { %1499 = vst [vmem:[#allocation2 + $0x80] sm:$0xff] %v1467_v63  ;;  %v1378_v10 = vadd.f32 %v1377_v0, %v1152_v3  ;;  %v1154_v12 = vpop.f32.mrb[67].mxu1  ;;  %v995_v3 = vld [vmem:[#allocation2 + $0xd0] sm:$0xff] }
 0x3bc   : > { %v1468_v13 = vadd.f32 %v1378_v10, %v986_v5  ;;  %v1382_v16 = vpop.f32.mrb[68].mxu0 }
 0x3bd   : > { %v1157_v18 = vpop.f32.mrb[68].mxu1  ;;  %v1384_v21 = vpop.f32.mrb[69].mxu0 }
 0x3be   : > { %1500 = vst [vmem:[#allocation2 + $0x88] sm:$0xff] %v1468_v13  ;;  %v1383_v23 = vadd.f32 %v1382_v16, %v1157_v18  ;;  %v1159_v25 = vpop.f32.mrb[69].mxu1  ;;  %v996_v18 = vld [vmem:[#allocation2 + $0xd8] sm:$0xff] }
 0x3c0   : > { %v1469_v8 = vadd.f32 %v1383_v23, %v987_v20  ;;  %v1387_v29 = vpop.f32.mrb[70].mxu0 }
 0x3c1   : > { %v1162_v30 = vpop.f32.mrb[70].mxu1  ;;  %v1389_v34 = vpop.f32.mrb[71].mxu0 }
 0x3c2   : > { %1501 = vst [vmem:[#allocation2 + $0x90] sm:$0xff] %v1469_v8  ;;  %v1388_v19 = vadd.f32 %v1387_v29, %v1162_v30  ;;  %v1164_v36 = vpop.f32.mrb[71].mxu1  ;;  %v997_v30 = vld [vmem:[#allocation2 + $0xe0] sm:$0xff] }
 0x3c4   : > { %v1470_v38 = vadd.f32 %v1388_v19, %v988_v32  ;;  %v1392_v41 = vpop.f32.mrb[72].mxu0 }
 0x3c5   : > { %v1167_v42 = vpop.f32.mrb[72].mxu1  ;;  %v1394_v46 = vpop.f32.mrb[73].mxu0 }
 0x3c6   : > { %1502 = vst [vmem:[#allocation2 + $0x98] sm:$0xff] %v1470_v38  ;;  %v1393_v48 = vadd.f32 %v1392_v41, %v1167_v42  ;;  %v1169_v50 = vpop.f32.mrb[73].mxu1  ;;  %v998_v42 = vld [vmem:[#allocation2 + $0xe8] sm:$0xff] }
 0x3c8   : > { %v1471_v53 = vadd.f32 %v1393_v48, %v989_v44  ;;  %v1397_v54 = vpop.f32.mrb[74].mxu0 }
 0x3c9   : > { %v1172_v56 = vpop.f32.mrb[74].mxu1  ;;  %v1399_v60 = vpop.f32.mrb[75].mxu0 }
 0x3ca   : > { %1503 = vst [vmem:[#allocation2 + $0xa0] sm:$0xff] %v1471_v53  ;;  %v1398_v62 = vadd.f32 %v1397_v54, %v1172_v56  ;;  %v1174_v1 = vpop.f32.mrb[75].mxu1  ;;  %v999_v56 = vld [vmem:[#allocation2 + $0xf0] sm:$0xff] }
 0x3cc   : > { %v1472_v2 = vadd.f32 %v1398_v62, %v990_v58  ;;  %v1402_v4 = vpop.f32.mrb[76].mxu0 }
 0x3cd   : > { %v1177_v6 = vpop.f32.mrb[76].mxu1  ;;  %v1404_v11 = vpop.f32.mrb[77].mxu0 }
 0x3ce   : > { %1504 = vst [vmem:[#allocation2 + $0xa8] sm:$0xff] %v1472_v2  ;;  %v1403_v14 = vadd.f32 %v1402_v4, %v1177_v6  ;;  %v1179_v15 = vpop.f32.mrb[77].mxu1  ;;  %v1000_v6 = vld [vmem:[#allocation2 + $0xf8] sm:$0xff] }
 0x3d0   : > { %v1473_v17 = vadd.f32 %v1403_v14, %v991_v9  ;;  %v1407_v22 = vpop.f32.mrb[78].mxu0 }
 0x3d1   : > { %v1182_v24 = vpop.f32.mrb[78].mxu1  ;;  %v1409_v27 = vpop.f32.mrb[79].mxu0 }
 0x3d2   : > { %1505 = vst [vmem:[#allocation2 + $0xb0] sm:$0xff] %v1473_v17  ;;  %v1408_v28 = vadd.f32 %v1407_v22, %v1182_v24  ;;  %v1184_v31 = vpop.f32.mrb[79].mxu1  ;;  %v1551_v17 = vld [vmem:[#allocation12] sm:$0xff] (!%p2158_p0)  ;;  %v1552_v22 = vld [vmem:[#allocation12 + $0x8] sm:$0xff] (!%p2158_p0)  ;;  %v1553_v24 = vld [vmem:[#allocation12 + $0x10] sm:$0xff] (!%p2158_p0) }
 0x3d3   : > { %v1554_v27 = vld [vmem:[#allocation12 + $0x18] sm:$0xff] (!%p2158_p0)  ;;  %v1555_v31 = vld [vmem:[#allocation12 + $0x20] sm:$0xff] (!%p2158_p0) }
 0x3d4   : > { %v1474_v33 = vadd.f32 %v1408_v28, %v992_v26  ;;  %v1412_v35 = vpop.f32.mrb[80].mxu0  ;;  %v2424_v26 = vpack.c.bf16 (!%p2158_p0), %v1552_v22, %v1551_v17  ;;  %v2428_v28 = vpack.c.bf16 (!%p2158_p0), %v1554_v27, %v1553_v24 }
 0x3d5   : > { %v1187_v37 = vpop.f32.mrb[80].mxu1  ;;  %v1414_v40 = vpop.f32.mrb[81].mxu0 }
 0x3d6   : > { %1506 = vst [vmem:[#allocation2 + $0xb8] sm:$0xff] %v1474_v33  ;;  %v1413_v43 = vadd.f32 %v1412_v35, %v1187_v37  ;;  %v1189_v45 = vpop.f32.mrb[81].mxu1  ;;  %v1556_v33 = vld [vmem:[#allocation12 + $0x28] sm:$0xff] (!%p2158_p0)  ;;  %2425 = vmatprep.subr.bf16.mxu0 (!%p2158_p0), %v2424_v26  ;;  %2472 = vmatprep.subr.bf16.mxu1 (!%p2158_p0), %v2424_v26  ;;  %v1519_v37 = vld [vmem:[%s3572_s8] sm:$0xff] (!%p2158_p0)  ;;  %v1557_v40 = vld [vmem:[#allocation12 + $0x30] sm:$0xff] (!%p2158_p0) }
 0x3d7   : > { %2427 = vmatpush3.bf16.msra.mxu0 (!%p2158_p0), %v2424_v26  ;;  %2480 = vmatpush3.bf16.msra.mxu1 (!%p2158_p0), %v2424_v26  ;;  %v2432_v35 = vpack.c.bf16 (!%p2158_p0), %v1556_v33, %v1555_v31  ;;  %v1811_v31 = vld [vmem:[#allocation2 + $0x98] sm:$0xff] (!%p2158_p0) }
 0x3d8   : > { %v1475_v47 = vadd.f32 %v1413_v43, %v993_v39  ;;  %v1417_v49 = vpop.f32.mrb[82].mxu0  ;;  %2429 = vmatprep.subr.bf16.mxu0 (!%p2158_p0), %v2428_v28  ;;  %2473 = vmatprep.subr.bf16.mxu1 (!%p2158_p0), %v2428_v28  ;;  %v1535_v39 = vld [vmem:[%s3572_s8 + $0x80] sm:$0xff] (!%p2158_p0)  ;;  %v1558_v43 = vld [vmem:[#allocation12 + $0x38] sm:$0xff] (!%p2158_p0) }
 0x3d9   : > { %v1192_v51 = vpop.f32.mrb[82].mxu1  ;;  %v1419_v55 = vpop.f32.mrb[83].mxu0  ;;  %2248 = vmatprep.mubr.f32.mxu0 (!%p2158_p0), %v1519_v37  ;;  %2272 = vmatprep.mubr.f32.mxu1 (!%p2158_p0), %v1535_v39  ;;  %v2436_v45 = vpack.c.bf16 (!%p2158_p0), %v1558_v43, %v1557_v40  ;;  %v1794_v37 = vld [vmem:[#allocation2 + $0x10] sm:$0xff] (!%p2158_p0) }
 0x3da   : > { %1507 = vst [vmem:[#allocation2 + $0xc0] sm:$0xff] %v1475_v47  ;;  %v1418_v57 = vadd.f32 %v1417_v49, %v1192_v51  ;;  %v1194_v59 = vpop.f32.mrb[83].mxu1  ;;  %v1559_v47 = vld [vmem:[#allocation12 + $0x40] sm:$0xff] (!%p2158_p0)  ;;  %v1560_v49 = vld [vmem:[#allocation12 + $0x48] sm:$0xff] (!%p2158_p0)  ;;  %v1562_v55 = vld [vmem:[#allocation12 + $0x58] sm:$0xff] (!%p2158_p0) }
 0x3db   : > { %2431 = vmatpush3.bf16.msra.mxu0 (!%p2158_p0), %v2428_v28  ;;  %2481 = vmatpush3.bf16.msra.mxu1 (!%p2158_p0), %v2428_v28  ;;  %v2440_v51 = vpack.c.bf16 (!%p2158_p0), %v1560_v49, %v1559_v47  ;;  %v1563_v59 = vld [vmem:[#allocation12 + $0x60] sm:$0xff] (!%p2158_p0)  ;;  %v1795_v28 = vld [vmem:[#allocation2 + $0x18] sm:$0xff] (!%p2158_p0)  ;;  %v1810_v39 = vld [vmem:[#allocation2 + $0x90] sm:$0xff] (!%p2158_p0) }
 0x3dc   : > { %v1476_v61 = vadd.f32 %v1418_v57, %v994_v52  ;;  %v1422_v63 = vpop.f32.mrb[84].mxu0  ;;  %2433 = vmatprep.subr.bf16.mxu0 (!%p2158_p0), %v2432_v35  ;;  %2474 = vmatprep.subr.bf16.mxu1 (!%p2158_p0), %v2432_v35  ;;  %v1561_v52 = vld [vmem:[#allocation12 + $0x50] sm:$0xff] (!%p2158_p0) }
 0x3dd   : > { %v1197_v0 = vpop.f32.mrb[84].mxu1  ;;  %v1424_v5 = vpop.f32.mrb[85].mxu0  ;;  %v2444_v57 = vpack.c.bf16 (!%p2158_p0), %v1562_v55, %v1561_v52 }
 0x3de   : > { %1508 = vst [vmem:[#allocation2 + $0xc8] sm:$0xff] %v1476_v61  ;;  %v1423_v7 = vadd.f32 %v1422_v63, %v1197_v0  ;;  %v1199_v10 = vpop.f32.mrb[85].mxu1  ;;  %v1564_v61 = vld [vmem:[#allocation12 + $0x68] sm:$0xff] (!%p2158_p0)  ;;  %v1565_v0 = vld [vmem:[#allocation12 + $0x70] sm:$0xff] (!%p2158_p0) }
 0x3df   : > { %2435 = vmatpush3.bf16.msra.mxu0 (!%p2158_p0), %v2432_v35  ;;  %2482 = vmatpush3.bf16.msra.mxu1 (!%p2158_p0), %v2432_v35  ;;  %v2448_v63 = vpack.c.bf16 (!%p2158_p0), %v1564_v61, %v1563_v59  ;;  %v1536_v10 = vld [vmem:[%s3572_s8 + $0x88] sm:$0xff] (!%p2158_p0) }
 0x3e0   : > { %v1477_v12 = vadd.f32 %v1423_v7, %v995_v3  ;;  %v1427_v13 = vpop.f32.mrb[86].mxu0  ;;  %2437 = vmatprep.subr.bf16.mxu0 (!%p2158_p0), %v2436_v45  ;;  %2475 = vmatprep.subr.bf16.mxu1 (!%p2158_p0), %v2436_v45  ;;  %v1566_v3 = vld [vmem:[#allocation12 + $0x78] sm:$0xff] (!%p2158_p0)  ;;  %v1520_v7 = vld [vmem:[%s3572_s8 + $0x8] sm:$0xff] (!%p2158_p0) }
 0x3e1   : > { %v1202_v16 = vpop.f32.mrb[86].mxu1  ;;  %v1429_v20 = vpop.f32.mrb[87].mxu0  ;;  %v2452_v5 = vpack.c.bf16 (!%p2158_p0), %v1566_v3, %v1565_v0  ;;  %v1797_v61 = vld [vmem:[#allocation2 + $0x28] sm:$0xff] (!%p2158_p0) }
 0x3e2   : > { %1509 = vst [vmem:[#allocation2 + $0xd0] sm:$0xff] %v1477_v12  ;;  %v1428_v21 = vadd.f32 %v1427_v13, %v1202_v16  ;;  %v1204_v23 = vpop.f32.mrb[87].mxu1  ;;  %v1521_v12 = vld [vmem:[%s3572_s8 + $0x10] sm:$0xff] (!%p2158_p0)  ;;  %v1522_v16 = vld [vmem:[%s3572_s8 + $0x18] sm:$0xff] (!%p2158_p0)  ;;  %v1523_v20 = vld [vmem:[%s3572_s8 + $0x20] sm:$0xff] (!%p2158_p0) }
 0x3e3   : > { %2439 = vmatpush3.bf16.msra.mxu0 (!%p2158_p0), %v2436_v45  ;;  %2483 = vmatpush3.bf16.msra.mxu1 (!%p2158_p0), %v2436_v45  ;;  %v1537_v13 = vld [vmem:[%s3572_s8 + $0x90] sm:$0xff] (!%p2158_p0)  ;;  %v1524_v23 = vld [vmem:[%s3572_s8 + $0x28] sm:$0xff] (!%p2158_p0) }
 0x3e4   : > { %v1478_v25 = vadd.f32 %v1428_v21, %v996_v18  ;;  %v1432_v8 = vpop.f32.mrb[88].mxu0  ;;  %2441 = vmatprep.subr.bf16.mxu0 (!%p2158_p0), %v2440_v51  ;;  %2476 = vmatprep.subr.bf16.mxu1 (!%p2158_p0), %v2440_v51  ;;  %v1538_v18 = vld [vmem:[%s3572_s8 + $0x98] sm:$0xff] (!%p2158_p0)  ;;  %v1539_v21 = vld [vmem:[%s3572_s8 + $0xa0] sm:$0xff] (!%p2158_p0) }
 0x3e5   : > { %v1207_v29 = vpop.f32.mrb[88].mxu1  ;;  %v1434_v32 = vpop.f32.mrb[89].mxu0 }
 0x3e6   : > { %1510 = vst [vmem:[#allocation2 + $0xd8] sm:$0xff] %v1478_v25  ;;  %v1433_v34 = vadd.f32 %v1432_v8, %v1207_v29  ;;  %v1209_v19 = vpop.f32.mrb[89].mxu1  ;;  %v1540_v25 = vld [vmem:[%s3572_s8 + $0xa8] sm:$0xff] (!%p2158_p0)  ;;  %v1525_v8 = vld [vmem:[%s3572_s8 + $0x30] sm:$0xff] (!%p2158_p0)  ;;  %v1542_v32 = vld [vmem:[%s3572_s8 + $0xb8] sm:$0xff] (!%p2158_p0) }
 0x3e7   : > { %2443 = vmatpush3.bf16.msra.mxu0 (!%p2158_p0), %v2440_v51  ;;  %2484 = vmatpush3.bf16.msra.mxu1 (!%p2158_p0), %v2440_v51  ;;  %v1541_v29 = vld [vmem:[%s3572_s8 + $0xb0] sm:$0xff] (!%p2158_p0)  ;;  %v1543_v19 = vld [vmem:[%s3572_s8 + $0xc0] sm:$0xff] (!%p2158_p0) }
 0x3e8   : > { %v1479_v36 = vadd.f32 %v1433_v34, %v997_v30  ;;  %v1437_v38 = vpop.f32.mrb[90].mxu0  ;;  %2445 = vmatprep.subr.bf16.mxu0 (!%p2158_p0), %v2444_v57  ;;  %2477 = vmatprep.subr.bf16.mxu1 (!%p2158_p0), %v2444_v57  ;;  %v1526_v30 = vld [vmem:[%s3572_s8 + $0x38] sm:$0xff] (!%p2158_p0)  ;;  %v1527_v34 = vld [vmem:[%s3572_s8 + $0x40] sm:$0xff] (!%p2158_p0) }
 0x3e9   : > { %v1212_v41 = vpop.f32.mrb[90].mxu1  ;;  %v1439_v44 = vpop.f32.mrb[91].mxu0 }
 0x3ea   : > { %1511 = vst [vmem:[#allocation2 + $0xe0] sm:$0xff] %v1479_v36  ;;  %v1438_v46 = vadd.f32 %v1437_v38, %v1212_v41  ;;  %v1214_v48 = vpop.f32.mrb[91].mxu1  ;;  %v1528_v36 = vld [vmem:[%s3572_s8 + $0x48] sm:$0xff] (!%p2158_p0)  ;;  %v1529_v41 = vld [vmem:[%s3572_s8 + $0x50] sm:$0xff] (!%p2158_p0)  ;;  %v1530_v44 = vld [vmem:[%s3572_s8 + $0x58] sm:$0xff] (!%p2158_p0) }
 0x3eb   : > { %2447 = vmatpush3.bf16.msra.mxu0 (!%p2158_p0), %v2444_v57  ;;  %2485 = vmatpush3.bf16.msra.mxu1 (!%p2158_p0), %v2444_v57  ;;  %v1544_v38 = vld [vmem:[%s3572_s8 + $0xc8] sm:$0xff] (!%p2158_p0)  ;;  %v1531_v48 = vld [vmem:[%s3572_s8 + $0x60] sm:$0xff] (!%p2158_p0) }
 0x3ec   : > { %v1480_v50 = vadd.f32 %v1438_v46, %v998_v42  ;;  %v1442_v53 = vpop.f32.mrb[92].mxu0  ;;  %2449 = vmatprep.subr.bf16.mxu0 (!%p2158_p0), %v2448_v63  ;;  %2478 = vmatprep.subr.bf16.mxu1 (!%p2158_p0), %v2448_v63  ;;  %v1545_v42 = vld [vmem:[%s3572_s8 + $0xd0] sm:$0xff] (!%p2158_p0)  ;;  %v1546_v46 = vld [vmem:[%s3572_s8 + $0xd8] sm:$0xff] (!%p2158_p0) }
 0x3ed   : > { %v1217_v54 = vpop.f32.mrb[92].mxu1  ;;  %v1444_v58 = vpop.f32.mrb[93].mxu0 }
 0x3ee   : > { %1512 = vst [vmem:[#allocation2 + $0xe8] sm:$0xff] %v1480_v50  ;;  %v1443_v60 = vadd.f32 %v1442_v53, %v1217_v54  ;;  %v1219_v62 = vpop.f32.mrb[93].mxu1  ;;  %v1547_v50 = vld [vmem:[%s3572_s8 + $0xe0] sm:$0xff] (!%p2158_p0)  ;;  %v1532_v53 = vld [vmem:[%s3572_s8 + $0x68] sm:$0xff] (!%p2158_p0)  ;;  %v1549_v58 = vld [vmem:[%s3572_s8 + $0xf0] sm:$0xff] (!%p2158_p0) }
 0x3ef   : > { %2451 = vmatpush3.bf16.msra.mxu0 (!%p2158_p0), %v2448_v63  ;;  %2486 = vmatpush3.bf16.msra.mxu1 (!%p2158_p0), %v2448_v63  ;;  %v1548_v54 = vld [vmem:[%s3572_s8 + $0xe8] sm:$0xff] (!%p2158_p0)  ;;  %v1550_v62 = vld [vmem:[%s3572_s8 + $0xf8] sm:$0xff] (!%p2158_p0) }
 0x3f0   : > { %v1481_v1 = vadd.f32 %v1443_v60, %v999_v56  ;;  %v1447_v2 = vpop.f32.mrb[94].mxu0  ;;  %1518 = sbr.rel (%p2158_p0) target bundleno = 1260 (0x4ec), region = 84  ;;  %2453 = vmatprep.subr.bf16.mxu0 (!%p2158_p0), %v2452_v5  ;;  %2479 = vmatprep.subr.bf16.mxu1 (!%p2158_p0), %v2452_v5  ;;  %v1533_v56 = vld [vmem:[%s3572_s8 + $0x70] sm:$0xff] (!%p2158_p0)  ;;  %v1534_v60 = vld [vmem:[%s3572_s8 + $0x78] sm:$0xff] (!%p2158_p0)  ;;  %v1813_v63 = vld [vmem:[#allocation2 + $0xa8] sm:$0xff] (!%p2158_p0) }
 0x3f1   : > { %v1222_v4 = vpop.f32.mrb[94].mxu1  ;;  %v1449_v9 = vpop.f32.mrb[95].mxu0 }
 0x3f2   : > { %1513 = vst [vmem:[#allocation2 + $0xf0] sm:$0xff] %v1481_v1  ;;  %v1448_v11 = vadd.f32 %v1447_v2, %v1222_v4  ;;  %v1224_v14 = vpop.f32.mrb[95].mxu1  ;;  %v1793_v1 = vld [vmem:[#allocation2 + $0x8] sm:$0xff] (!%p2158_p0)  ;;  %v1792_v4 = vld [vmem:[#allocation2] sm:$0xff] (!%p2158_p0) }
 0x3f3   : > { %2455 = vmatpush3.bf16.msra.mxu0 (!%p2158_p0), %v2452_v5  ;;  %2487 = vmatpush3.bf16.msra.mxu1 (!%p2158_p0), %v2452_v5  ;;  %v1809_v2 = vld [vmem:[#allocation2 + $0x88] sm:$0xff] (!%p2158_p0)  ;;  %v1796_v5 = vld [vmem:[#allocation2 + $0x20] sm:$0xff] (!%p2158_p0) }
 0x3f4   : > { %v1482_v15 = vadd.f32 %v1448_v11, %v1000_v6  ;;  %v1808_v6 = vld [vmem:[#allocation2 + $0x80] sm:$0xff] (!%p2158_p0) }
 0x3f5   : > { %v3952_v11 = vld [vmem:[#allocation14] ss:$0 sm:$0xff] (!%p2158_p0) }
 0x3f6   : > { %1514 = vst [vmem:[#allocation2 + $0xf8] sm:$0xff] %v1482_v15  ;;  %2249 = vmatmul.mubr.f32.vlgmr.msra.gmra.mrb[0].mxu0 (!%p2158_p0), %v1520_v7  ;;  %2273 = vmatmul.mubr.f32.vlgmr.msra.gmra.mrb[0].mxu1 (!%p2158_p0), %v1536_v10  ;;  %v1812_v7 = vld [vmem:[#allocation2 + $0xa0] sm:$0xff] (!%p2158_p0) }
 0x3f7   : > { %2251 = vmatprep.mubr.f32.mxu0 %v1521_v12  ;;  %2275 = vmatprep.mubr.f32.mxu1 %v1537_v13 }
 0x3fa   : > { %2252 = vmatmul.mubr.f32.gmra.mrb[2].mxu0 %v1522_v16  ;;  %2276 = vmatmul.mubr.f32.gmra.mrb[2].mxu1 %v1538_v18 }
 0x3fb   : > { %2254 = vmatprep.mubr.f32.mxu0 %v1523_v20  ;;  %2278 = vmatprep.mubr.f32.mxu1 %v1539_v21 }
 0x3fe   : > { %2255 = vmatmul.mubr.f32.gmra.mrb[4].mxu0 %v1524_v23  ;;  %2279 = vmatmul.mubr.f32.gmra.mrb[4].mxu1 %v1540_v25 }
 0x3ff   : > { %2257 = vmatprep.mubr.f32.mxu0 %v1525_v8  ;;  %2281 = vmatprep.mubr.f32.mxu1 %v1541_v29  ;;  %v1799_v29 = vld [vmem:[#allocation2 + $0x38] sm:$0xff] }
 0x402   : > { %2258 = vmatmul.mubr.f32.gmra.mrb[6].mxu0 %v1526_v30  ;;  %2282 = vmatmul.mubr.f32.gmra.mrb[6].mxu1 %v1542_v32  ;;  %v1815_v30 = vld [vmem:[#allocation2 + $0xb8] sm:$0xff] }
 0x403   : > { %2260 = vmatprep.mubr.f32.mxu0 %v1527_v34  ;;  %2284 = vmatprep.mubr.f32.mxu1 %v1543_v19  ;;  %v1798_v19 = vld [vmem:[#allocation2 + $0x30] sm:$0xff] }
 0x406   : > { %2261 = vmatmul.mubr.f32.gmra.mrb[8].mxu0 %v1528_v36  ;;  %2285 = vmatmul.mubr.f32.gmra.mrb[8].mxu1 %v1544_v38  ;;  %v1814_v36 = vld [vmem:[#allocation2 + $0xb0] sm:$0xff] }
 0x407   : > { %2263 = vmatprep.mubr.f32.mxu0 %v1529_v41  ;;  %2287 = vmatprep.mubr.f32.mxu1 %v1545_v42 }
 0x40a   : > { %2264 = vmatmul.mubr.f32.gmra.mrb[10].mxu0 %v1530_v44  ;;  %2288 = vmatmul.mubr.f32.gmra.mrb[10].mxu1 %v1546_v46 }
 0x40b   : > { %2266 = vmatprep.mubr.f32.mxu0 %v1531_v48  ;;  %2290 = vmatprep.mubr.f32.mxu1 %v1547_v50 }
 0x40e   : > { %2267 = vmatmul.mubr.f32.gmra.mrb[12].mxu0 %v1532_v53  ;;  %2291 = vmatmul.mubr.f32.gmra.mrb[12].mxu1 %v1548_v54 }
 0x40f   : > { %2269 = vmatprep.mubr.f32.mxu0 %v1533_v56  ;;  %2293 = vmatprep.mubr.f32.mxu1 %v1549_v58  ;;  %v1801_v58 = vld [vmem:[#allocation2 + $0x48] sm:$0xff] }
 0x412   : > { %2270 = vmatmul.mubr.f32.gmra.mrb[14].mxu0 %v1534_v60  ;;  %2294 = vmatmul.mubr.f32.gmra.mrb[14].mxu1 %v1550_v62  ;;  %v1817_v60 = vld [vmem:[#allocation2 + $0xc8] sm:$0xff] }
 0x4c9   : > { %v2250_v9 = vpop.f32.mrb[0].mxu0  ;;  %v2274_v14 = vpop.f32.mrb[0].mxu1 }
 0x4ca   : > { %v1825_v15 = vadd.f32 %v2250_v9, %v1793_v1  ;;  %v1841_v17 = vadd.f32 %v2274_v14, %v1809_v2  ;;  %v1633_v22 = vpop.f32.mrb[1].mxu0  ;;  %v1713_v24 = vpop.f32.mrb[1].mxu1  ;;  %v1800_v2 = vld [vmem:[#allocation2 + $0x40] sm:$0xff] }
 0x4cb   : > { %v1824_v26 = vadd.f32 %v1792_v4, %v1633_v22  ;;  %v1840_v27 = vadd.f32 %v1808_v6, %v1713_v24  ;;  %v1816_v4 = vld [vmem:[#allocation2 + $0xc0] sm:$0xff] }
 0x4cc   : > { %v1864_v33 = vadd.f32 %v3952_v11, %v1825_v15  ;;  %v1880_v35 = vadd.f32 %v3952_v11, %v1841_v17 }
 0x4cd   : > { %v1863_v40 = vadd.f32 %v3952_v11, %v1824_v26  ;;  %v1879_v43 = vadd.f32 %v3952_v11, %v1840_v27  ;;  %v2253_v45 = vpop.f32.mrb[2].mxu0  ;;  %v2277_v47 = vpop.f32.mrb[2].mxu1 }
 0x4ce   : > { %1896 = vst [vmem:[%s3593_s7 + $0x8] sm:$0xff] %v1864_v33  ;;  %1912 = vst [vmem:[%s3593_s7 + $0x88] sm:$0xff] %v1880_v35  ;;  %v1827_v49 = vadd.f32 %v2253_v45, %v1795_v28  ;;  %v1843_v51 = vadd.f32 %v2277_v47, %v1811_v31  ;;  %v1643_v52 = vpop.f32.mrb[3].mxu0  ;;  %v1723_v55 = vpop.f32.mrb[3].mxu1  ;;  %v1803_v31 = vld [vmem:[#allocation2 + $0x58] sm:$0xff] }
 0x4cf   : > { %1895 = vst [vmem:[%s3593_s7] sm:$0xff] %v1863_v40  ;;  %1911 = vst [vmem:[%s3593_s7 + $0x80] sm:$0xff] %v1879_v43  ;;  %v1826_v57 = vadd.f32 %v1794_v37, %v1643_v52  ;;  %v1842_v59 = vadd.f32 %v1810_v39, %v1723_v55  ;;  %v1819_v33 = vld [vmem:[#allocation2 + $0xd8] sm:$0xff]  ;;  %v1802_v39 = vld [vmem:[#allocation2 + $0x50] sm:$0xff] }
 0x4d0   : > { %v1866_v0 = vadd.f32 %v3952_v11, %v1827_v49  ;;  %v1882_v3 = vadd.f32 %v3952_v11, %v1843_v51  ;;  %v1818_v40 = vld [vmem:[#allocation2 + $0xd0] sm:$0xff] }
 0x4d1   : > { %v1865_v10 = vadd.f32 %v3952_v11, %v1826_v57  ;;  %v1881_v12 = vadd.f32 %v3952_v11, %v1842_v59  ;;  %v2256_v13 = vpop.f32.mrb[4].mxu0  ;;  %v2280_v16 = vpop.f32.mrb[4].mxu1 }
 0x4d2   : > { %1898 = vst [vmem:[%s3593_s7 + $0x18] sm:$0xff] %v1866_v0  ;;  %1914 = vst [vmem:[%s3593_s7 + $0x98] sm:$0xff] %v1882_v3  ;;  %v1829_v18 = vadd.f32 %v2256_v13, %v1797_v61  ;;  %v1845_v20 = vadd.f32 %v2280_v16, %v1813_v63  ;;  %v1653_v21 = vpop.f32.mrb[5].mxu0  ;;  %v1733_v23 = vpop.f32.mrb[5].mxu1  ;;  %v1805_v63 = vld [vmem:[#allocation2 + $0x68] sm:$0xff] }
 0x4d3   : > { %1897 = vst [vmem:[%s3593_s7 + $0x10] sm:$0xff] %v1865_v10  ;;  %1913 = vst [vmem:[%s3593_s7 + $0x90] sm:$0xff] %v1881_v12  ;;  %v1828_v25 = vadd.f32 %v1796_v5, %v1653_v21  ;;  %v1844_v8 = vadd.f32 %v1812_v7, %v1733_v23  ;;  %v1821_v0 = vld [vmem:[#allocation2 + $0xe8] sm:$0xff]  ;;  %v1804_v7 = vld [vmem:[#allocation2 + $0x60] sm:$0xff] }
 0x4d4   : > { %v1868_v32 = vadd.f32 %v3952_v11, %v1829_v18  ;;  %v1884_v34 = vadd.f32 %v3952_v11, %v1845_v20  ;;  %v1820_v10 = vld [vmem:[#allocation2 + $0xe0] sm:$0xff] }
 0x4d5   : > { %v1867_v38 = vadd.f32 %v3952_v11, %v1828_v25  ;;  %v1883_v41 = vadd.f32 %v3952_v11, %v1844_v8  ;;  %v2259_v42 = vpop.f32.mrb[6].mxu0  ;;  %v2283_v44 = vpop.f32.mrb[6].mxu1 }
 0x4d6   : > { %1900 = vst [vmem:[%s3593_s7 + $0x28] sm:$0xff] %v1868_v32  ;;  %1916 = vst [vmem:[%s3593_s7 + $0xa8] sm:$0xff] %v1884_v34  ;;  %v1831_v46 = vadd.f32 %v2259_v42, %v1799_v29  ;;  %v1847_v48 = vadd.f32 %v2283_v44, %v1815_v30  ;;  %v1663_v50 = vpop.f32.mrb[7].mxu0  ;;  %v1743_v53 = vpop.f32.mrb[7].mxu1  ;;  %v1807_v30 = vld [vmem:[#allocation2 + $0x78] sm:$0xff] }
 0x4d7   : > { %1899 = vst [vmem:[%s3593_s7 + $0x20] sm:$0xff] %v1867_v38  ;;  %1915 = vst [vmem:[%s3593_s7 + $0xa0] sm:$0xff] %v1883_v41  ;;  %v1830_v54 = vadd.f32 %v1798_v19, %v1663_v50  ;;  %v1846_v56 = vadd.f32 %v1814_v36, %v1743_v53  ;;  %v1823_v32 = vld [vmem:[#allocation2 + $0xf8] sm:$0xff]  ;;  %v1806_v36 = vld [vmem:[#allocation2 + $0x70] sm:$0xff] }
 0x4d8   : > { %v1870_v62 = vadd.f32 %v3952_v11, %v1831_v46  ;;  %v1886_v1 = vadd.f32 %v3952_v11, %v1847_v48  ;;  %v1822_v38 = vld [vmem:[#allocation2 + $0xf0] sm:$0xff] }
 0x4d9   : > { %v1869_v6 = vadd.f32 %v3952_v11, %v1830_v54  ;;  %v1885_v9 = vadd.f32 %v3952_v11, %v1846_v56  ;;  %v2262_v14 = vpop.f32.mrb[8].mxu0  ;;  %v2286_v15 = vpop.f32.mrb[8].mxu1 }
 0x4da   : > { %1902 = vst [vmem:[%s3593_s7 + $0x38] sm:$0xff] %v1870_v62  ;;  %1918 = vst [vmem:[%s3593_s7 + $0xb8] sm:$0xff] %v1886_v1  ;;  %v1833_v17 = vadd.f32 %v2262_v14, %v1801_v58  ;;  %v1849_v22 = vadd.f32 %v2286_v15, %v1817_v60  ;;  %v1673_v24 = vpop.f32.mrb[9].mxu0  ;;  %v1753_v26 = vpop.f32.mrb[9].mxu1 }
 0x4db   : > { %1901 = vst [vmem:[%s3593_s7 + $0x30] sm:$0xff] %v1869_v6  ;;  %1917 = vst [vmem:[%s3593_s7 + $0xb0] sm:$0xff] %v1885_v9  ;;  %v1832_v27 = vadd.f32 %v1800_v2, %v1673_v24  ;;  %v1848_v28 = vadd.f32 %v1816_v4, %v1753_v26 }
 0x4dc   : > { %v1872_v35 = vadd.f32 %v3952_v11, %v1833_v17  ;;  %v1888_v37 = vadd.f32 %v3952_v11, %v1849_v22 }
 0x4dd   : > { %v1871_v43 = vadd.f32 %v3952_v11, %v1832_v27  ;;  %v1887_v45 = vadd.f32 %v3952_v11, %v1848_v28  ;;  %v2265_v47 = vpop.f32.mrb[10].mxu0  ;;  %v2289_v49 = vpop.f32.mrb[10].mxu1 }
 0x4de   : > { %1904 = vst [vmem:[%s3593_s7 + $0x48] sm:$0xff] %v1872_v35  ;;  %1920 = vst [vmem:[%s3593_s7 + $0xc8] sm:$0xff] %v1888_v37  ;;  %v1835_v51 = vadd.f32 %v2265_v47, %v1803_v31  ;;  %v1851_v52 = vadd.f32 %v2289_v49, %v1819_v33  ;;  %v1683_v55 = vpop.f32.mrb[11].mxu0  ;;  %v1763_v57 = vpop.f32.mrb[11].mxu1 }
 0x4df   : > { %1903 = vst [vmem:[%s3593_s7 + $0x40] sm:$0xff] %v1871_v43  ;;  %1919 = vst [vmem:[%s3593_s7 + $0xc0] sm:$0xff] %v1887_v45  ;;  %v1834_v59 = vadd.f32 %v1802_v39, %v1683_v55  ;;  %v1850_v61 = vadd.f32 %v1818_v40, %v1763_v57 }
 0x4e0   : > { %v1874_v3 = vadd.f32 %v3952_v11, %v1835_v51  ;;  %v1890_v5 = vadd.f32 %v3952_v11, %v1851_v52 }
 0x4e1   : > { %v1873_v12 = vadd.f32 %v3952_v11, %v1834_v59  ;;  %v1889_v13 = vadd.f32 %v3952_v11, %v1850_v61  ;;  %v2268_v16 = vpop.f32.mrb[12].mxu0  ;;  %v2292_v18 = vpop.f32.mrb[12].mxu1 }
 0x4e2   : > { %1906 = vst [vmem:[%s3593_s7 + $0x58] sm:$0xff] %v1874_v3  ;;  %1922 = vst [vmem:[%s3593_s7 + $0xd8] sm:$0xff] %v1890_v5  ;;  %v1837_v20 = vadd.f32 %v2268_v16, %v1805_v63  ;;  %v1853_v21 = vadd.f32 %v2292_v18, %v1821_v0  ;;  %v1693_v23 = vpop.f32.mrb[13].mxu0  ;;  %v1773_v25 = vpop.f32.mrb[13].mxu1 }
 0x4e3   : > { %1905 = vst [vmem:[%s3593_s7 + $0x50] sm:$0xff] %v1873_v12  ;;  %1921 = vst [vmem:[%s3593_s7 + $0xd0] sm:$0xff] %v1889_v13  ;;  %v1836_v8 = vadd.f32 %v1804_v7, %v1693_v23  ;;  %v1852_v29 = vadd.f32 %v1820_v10, %v1773_v25 }
 0x4e4   : > { %v1876_v34 = vadd.f32 %v3952_v11, %v1837_v20  ;;  %v1892_v19 = vadd.f32 %v3952_v11, %v1853_v21 }
 0x4e5   : > { %v1875_v41 = vadd.f32 %v3952_v11, %v1836_v8  ;;  %v1891_v42 = vadd.f32 %v3952_v11, %v1852_v29  ;;  %v2271_v44 = vpop.f32.mrb[14].mxu0  ;;  %v2295_v46 = vpop.f32.mrb[14].mxu1 }
 0x4e6   : > { %1908 = vst [vmem:[%s3593_s7 + $0x68] sm:$0xff] %v1876_v34  ;;  %1924 = vst [vmem:[%s3593_s7 + $0xe8] sm:$0xff] %v1892_v19  ;;  %v1839_v48 = vadd.f32 %v2271_v44, %v1807_v30  ;;  %v1855_v50 = vadd.f32 %v2295_v46, %v1823_v32  ;;  %v1703_v53 = vpop.f32.mrb[15].mxu0  ;;  %v1783_v54 = vpop.f32.mrb[15].mxu1 }
 0x4e7   : > { %1907 = vst [vmem:[%s3593_s7 + $0x60] sm:$0xff] %v1875_v41  ;;  %1923 = vst [vmem:[%s3593_s7 + $0xe0] sm:$0xff] %v1891_v42  ;;  %v1838_v56 = vadd.f32 %v1806_v36, %v1703_v53  ;;  %v1854_v58 = vadd.f32 %v1822_v38, %v1783_v54 }
 0x4e8   : > { %v1878_v60 = vadd.f32 %v3952_v11, %v1839_v48  ;;  %v1894_v62 = vadd.f32 %v3952_v11, %v1855_v50 }
 0x4e9   : > { %v1877_v1 = vadd.f32 %v3952_v11, %v1838_v56  ;;  %v1893_v2 = vadd.f32 %v3952_v11, %v1854_v58 }
 0x4ea   : > { %1910 = vst [vmem:[%s3593_s7 + $0x78] sm:$0xff] %v1878_v60  ;;  %1926 = vst [vmem:[%s3593_s7 + $0xf8] sm:$0xff] %v1894_v62 }
 0x4eb   : > { %1909 = vst [vmem:[%s3593_s7 + $0x70] sm:$0xff] %v1877_v1  ;;  %1925 = vst [vmem:[%s3593_s7 + $0xf0] sm:$0xff] %v1893_v2 }
 0x4ec PF: > { %s4222_s23 = sld [smem:[#allocation28_spill]]  ;;  %s4223_s25 = sld [smem:[#allocation42_spill]] }
 0x4ed   : > { %s1941_s19 = sshll.u32 %s3593_s7, 4  ;;  %s4029_s21 = scalar_lea.sflag [#allocation5], %s408_s10  ;;  %s4025_s19 = int_to_ptr.vmem [resolvable:$true] %s1941_s19 }
 0x4ee   : > { %s2876_s8 = scalar_lea.vmem %s4025_s19, 4096  ;;  %p4225_p12 = scmp.ne.s32.totalorder %s4187_s11, 0 }
 0x4ef   : > { %p2877_p10 = scmp.ne.s32.totalorder %s4025_s19, %s2876_s8  ;;  %s3059_s12 = smov [#allocation15]  }
 0x4f0   : > { %s2880_s5 = sshll.u32 %s3059_s12, 4  ;;  %s2881_s5 = int_to_ptr.vmem [resolvable:$false] %s2880_s5 }
 0x4f1   : > { %p2878_p11 = pnand %p2877_p10, %p4225_p12  ;;  %s2882_s26 = scalar_lea.vmem %s2881_s5, 8192 }
 0x4f2   : > { %s2167_s30 = sshll.u32 %s4222_s23, 12  ;;  %s4224_s1 = smov %s4223_s25 }
 0x4f3   : > { %s4022_s3 = scalar_lea.hbm %s4223_s25, %s2167_s30  ;;  %p2879_p7 = pneg %p2878_p11 }
 0x4f4   : > { %p2883_p13 = scmp.lt.s32.totalorder %s4025_s19, %s2881_s5  ;;  %p2884_p9 = scmp.lt.s32.totalorder %s2882_s26, %s2876_s8 }
 0x4f6   : > { %p2885_p4 = por %p2884_p9, %p2883_p13 }
 0x4f8   : > { %p2886_p3 = pnand %p2885_p4, %p2879_p7 }
 0x4fa   : > { %2889 = shalt.err (!%p2886_p3)
}
 0x4fb   : > { %s2890_s10 = scalar_lea.hbm %s4022_s3, 4096  ;;  %s2894_s7 = scalar_lea.hbm %s4224_s1, 12288 }
 0x4fc   : > { %p2891_p5 = scmp.ne.s32.totalorder %s4022_s3, %s2890_s10  ;;  %p2895_p1 = scmp.lt.u32.totalorder %s4022_s3, %s4224_s1 }
 0x4fd   : > { %p2896_p6 = scmp.lt.u32.totalorder %s2894_s7, %s2890_s10  ;;  %p2898_p10 = scmp.lt.u32.totalorder %s2890_s10, %s4022_s3 }
 0x4fe   : > { %p2892_p2 = pnand %p2891_p5, %p4225_p12 }
 0x4ff   : > { %p2897_p0 = por %p2896_p6, %p2895_p1 }
 0x500   : > { %p2893_p8 = pneg %p2892_p2 }
 0x501   : > { %p2899_p11 = por %p2898_p10, %p2897_p0 }
 0x503   : > { %p2900_p7 = pnand %p2899_p11, %p2893_p8 }
 0x505   : > { %2903 = shalt.err (!%p2900_p7)
}
 0x506   : > { %s3060_s23 = smov 128   ;;  %s3061_s30 = smov 8  }
 0x507   : > { %2510 = dma.vmem_to_hbm [thread:$0]  (%p4225_p12), %s4025_s19, 4096, %s4022_s3, %s4029_s21, %s3060_s23, %s3060_s23, %s3061_s30  }
 0x508 PF: > { %p2546_p13 = scmp.ge.s32.totalorder %s3042_s14, 2  ;;  %s1956_s16 = sand.u32 1, %s3002_s27  }
 0x509   : > { %p4226_p9 = scmp.ne.s32.totalorder %s4190_s22, 0  ;;  %s1957_s18 = scalar_lea.sflag [#allocation5], %s1956_s16 }
 0x50b   : > { %p2536_p4 = pnand %p2546_p13, %p4226_p9 }
 0x50d   : > { %2985 = dma.done.wait (!%p2536_p4), %s1957_s18, 4096  }
 0x50e   : > { %2987 = vsyncadd (!%p2536_p4), %s1957_s18, 4294963200  ;;  %s30_s14 = sadd.s32 1, %s3042_s14   ;;  %s4228_s8 = sld [smem:[#allocation24_spill]] }
 0x50f   : > { %p4058_p3 = scmp.ge.s32.totalorder %s30_s14, 11   ;;  %s4229_s11 = sld [smem:[#allocation25_spill]] }
 0x510   : > { %s4230_s3 = smov %s3415_s24  ;;  %s4231_s30 = sld [smem:[#allocation26_spill]] }
 0x511   : > { %s4232_s19 = sld [smem:[#allocation35_spill]]  ;;  %s4233_s10 = sld [smem:[#allocation29_spill]] }
 0x512   : > { %s4234_s12 = sld [smem:[#allocation31_spill]]  ;;  %s4235_s22 = sld [smem:[#allocation33_spill]] }
 0x513   : > { %s4239_s26 = smov %s3491_s4  ;;  %s4240_s27 = smov %s3006_s28 }
 0x514   : > { %s4237_s24 = smov %s4228_s8  ;;  %s4241_s28 = smov %s3010_s29 }
 0x515   : > { %s4238_s25 = smov %s4229_s11  ;;  %s4242_s29 = smov %s4230_s3 }
 0x516   : > { %s4243_s8 = smov %s3022_s9  ;;  %s4245_s11 = smov %s3038_s13 }
 0x517   : > { %s4244_s9 = smov %s4232_s19  ;;  %29 = sbr.rel (!%p4058_p3) target bundleno = 23 (0x17), region = 150 }
 0x518   : > { %s4246_s13 = smov %s4235_s22 }
 0x51e   :  { %1962 = vsyncpa [#allocation4], 1 }
 0x51f   :  { %1964 = vsyncpa [#allocation4 + $0x1], 1 }
 0x520   :  { %1965 = vsyncpa [#allocation7], 1 }
 0x521   :  { %1967 = vsyncpa [#allocation7 + $0x1], 1 }
 0x522   :  { %1968 = vsyncpa [#allocation10], 1 }
 0x523   :  { %1970 = vsyncpa [#allocation10 + $0x1], 1 }
 0x524   :  { %1971 = vsyncpa [#allocation13], 1 }
 0x525   :  { %1972 = vsyncpa [#allocation5], 1 }
 0x526   :  { %1974 = vsyncpa [#allocation5 + $0x1], 1 }

</bundles_post_ra>
